<compile_context>
chip_gen: v7x
topology: tpu7x:2x2x1
jax: 0.10.0
libtpu: 0.0.40
codegen_flags: <defaults>
</compile_context>

<pallas_src>
import functools
import math

import jax
import jax.numpy as jnp
import numpy as np
from jax import lax
from jax.experimental import pallas as pl
from jax.experimental.pallas import tpu as pltpu


def _fusion_kernel(x1_ref, x2_ref, rt_ref, w_ref, b_ref, gamma_ref, beta_ref,
                   masks_ref, poolt_ref, out_ref, slab_ref, *, Bt, W, eps):
    BtC, HW = x1_ref.shape
    C = BtC // Bt
    bf16 = slab_ref.dtype

    # ---- bilinear resize folded in: ONE small MXU matmul (exact f32 weights)
    #      (Bt*C, H2*W2) @ (H2*W2, HW) -> (Bt*C, HW)
    x2u = jnp.dot(x2_ref[...], rt_ref[...], preferred_element_type=jnp.float32)

    # per-batch (C, HW) halves of the channel concat, reused by all 9 taps
    x1s = [x1_ref[b * C:(b + 1) * C, :] for b in range(Bt)]
    x2s = [x2u[b * C:(b + 1) * C, :] for b in range(Bt)]

    # ---- build the (9*2C, Bt*HW) im2col slab in bf16: tap-major, [x1 | x2],
    #      lane columns grouped per batch element.
    for dy in range(3):
        for dx in range(3):
            tap = dy * 3 + dx
            oy, ox = dy - 1, dx - 1
            r0 = tap * 2 * C
            if oy == 0 and ox == 0:                    # centre tap: no roll/mask
                for b in range(Bt):
                    c0 = b * HW
                    slab_ref[r0:r0 + C, c0:c0 + HW] = x1s[b].astype(bf16)
                    slab_ref[r0 + C:r0 + 2 * C, c0:c0 + HW] = x2s[b].astype(bf16)
            else:
                shift = (-(oy * W + ox)) % HW          # static lane rotation
                midx = tap if tap < 4 else tap - 1     # mask table skips centre
                mask = jnp.broadcast_to(masks_ref[midx:midx + 1, :], (C, HW))
                for b in range(Bt):
                    c0 = b * HW
                    t1 = pltpu.roll(x1s[b], shift, 1) * mask   # XLU roll + f32 mask
                    t2 = pltpu.roll(x2s[b], shift, 1) * mask
                    slab_ref[r0:r0 + C, c0:c0 + HW] = t1.astype(bf16)
                    slab_ref[r0 + C:r0 + 2 * C, c0:c0 + HW] = t2.astype(bf16)

    # ---- 3x3 SAME conv over the channel concat: ONE bf16 MXU matmul per step,
    #      K = 9*2C, N = Bt*HW lanes, f32 accumulate.
    y = jnp.dot(w_ref[...], slab_ref[...],
                preferred_element_type=jnp.float32)    # (C, Bt*HW) f32
    y = y + b_ref[...]                                 # + (C, 1) bias

    # ---- LayerNorm over the trailing W axis (stats per (batch, c, h)), f32.
    #      Two fused pooling matmuls against the lane-dense 0/1 matrix poolt.
    poolt = poolt_ref[...]                             # (Bt*H, Bt*HW)
    stats = lax.dot_general(jnp.concatenate([y, y * y], axis=0), poolt,
                            (((1,), (1,)), ((), ())),
                            preferred_element_type=jnp.float32)   # (2C, Bt*H)
    inv_w = 1.0 / W
    mean = stats[:C] * inv_w
    var = stats[C:] * inv_w - mean * mean              # biased variance (f32)
    rstd = lax.rsqrt(var + eps)
    back = jnp.dot(jnp.concatenate([-mean * rstd, rstd], axis=0), poolt,
                   preferred_element_type=jnp.float32)  # (2C, Bt*HW)
    out = (y * back[C:] + back[:C]) * gamma_ref[...] + beta_ref[...]

    # ---- lane-dense output stores, one (C, HW) tile per batch element
    for b in range(Bt):
        out_ref[b * C:(b + 1) * C, :] = out[:, b * HW:(b + 1) * HW].astype(out_ref.dtype)


def _interp_matrix(n_out, n_in):
    """1-D linear interpolation matrix (align_corners=True), shape (n_out, n_in)."""
    if n_out == 1:
        src = jnp.zeros((1,), jnp.float32)
    else:
        src = jnp.arange(n_out, dtype=jnp.float32) * ((n_in - 1) / (n_out - 1))
    lo = jnp.floor(src).astype(jnp.int32)
    hi = jnp.minimum(lo + 1, n_in - 1)
    frac = src - lo.astype(jnp.float32)
    r = jnp.arange(n_out)
    m = jnp.zeros((n_out, n_in), jnp.float32)
    m = m.at[r, lo].add(1.0 - frac)
    m = m.at[r, hi].add(frac)
    return m


def fusion_block(x1, x2, params, *, eps=1e-5, block_batch=None):
    """FusionBlock forward.  x1: (N, C, H, W), x2: (N, C, H2, W2), NCHW."""
    w, b, gamma, beta = params
    N, C, H, W = x1.shape
    N2, C2, H2, W2 = x2.shape
    assert N2 == N and C2 == C
    assert w.shape == (C, 2 * C, 3, 3), w.shape
    assert W == C, "nn.LayerNorm(channels) on an NCHW tensor requires W == channels"
    HW, H2W2 = H * W, H2 * W2

    # Batch elements per grid step: amortizes the fixed per-step overhead while
    # keeping >= 2 parallel grid blocks (v7x has 2 TensorCores) when N >= 2.
    if block_batch is None:
        block_batch = max(1, N // 2)
    Bt = max(1, min(block_batch, N))
    while N % Bt:
        Bt -= 1
    BHW = Bt * HW

    # NCHW -> (N*C, spatial): pure reshapes, spatial stays on the lane axis.
    x1f = x1.astype(jnp.float32).reshape(N * C, HW)
    x2f = x2.astype(jnp.float32).reshape(N * C, H2W2)

    # Bilinear align_corners=True resize as a matrix: x2u = x2f @ kron(Ry,Rx)^T.
    rt = jnp.kron(_interp_matrix(H, H2), _interp_matrix(W, W2)).T   # (H2W2, HW)

    # Conv weights reordered onto the slab's (tap-major, [x1|x2] channel) K axis,
    # pre-cast to bf16 (the kernel accumulates in f32).
    wmat = jnp.transpose(w.astype(jnp.float32), (0, 2, 3, 1)).reshape(C, 9 * 2 * C)
    wmat = wmat.astype(jnp.bfloat16)
    bcol = b.astype(jnp.float32).reshape(C, 1)

    # LayerNorm affine params tiled onto the flattened (Bt*HW) lane axis:
    # column (b*HW + h*W + w) multiplies gamma[w], adds beta[w].
    gamma_full = jnp.tile(gamma.astype(jnp.float32), Bt * H).reshape(1, BHW)
    beta_full = jnp.tile(beta.astype(jnp.float32), Bt * H).reshape(1, BHW)

    # 8 precomputed 0/1 boundary masks (all taps except the centre), (8, HW).
    hh = jnp.arange(HW) // W
    ww = jnp.arange(HW) % W
    rows = []
    for dy in range(3):
        for dx in range(3):
            if dy == 1 and dx == 1:
                continue
            oy, ox = dy - 1, dx - 1
            rows.append(((hh + oy >= 0) & (hh + oy < H) &
                         (ww + ox >= 0) & (ww + ox < W)).astype(jnp.float32))
    masks = jnp.stack(rows, axis=0)                                 # (8, HW)

    # Lane-dense 0/1 matrix grouping the W lanes of each (batch, h): used both
    # to reduce (LN stats) and to broadcast back (mean/rstd) on the MXU.
    poolt = (jnp.arange(BHW)[None, :] // W ==
             jnp.arange(Bt * H)[:, None]).astype(jnp.float32)       # (Bt*H, Bt*HW)

    kernel = functools.partial(_fusion_kernel, Bt=Bt, W=W, eps=eps)

    # TODO(synk): for production-sized feature maps add a second "parallel" grid
    # axis over H row-blocks (1-row halo in the x1/x2 index maps) and set
    # vmem_limit_bytes explicitly — needed under v7x's 64 MiB VMEM and to keep
    # both of its TensorCores busy when N is small.
    out = pl.pallas_call(
        kernel,
        out_shape=jax.ShapeDtypeStruct((N * C, HW), jnp.float32),
        grid_spec=pltpu.PrefetchScalarGridSpec(
            num_scalar_prefetch=0,
            grid=(N // Bt,),
            in_specs=[
                pl.BlockSpec((Bt * C, HW), lambda n: (n, 0)),        # x1
                pl.BlockSpec((Bt * C, H2W2), lambda n: (n, 0)),      # x2 (orig size)
                pl.BlockSpec((H2W2, HW), lambda n: (0, 0)),          # resize matrix
                pl.BlockSpec((C, 9 * 2 * C), lambda n: (0, 0)),      # conv weights bf16
                pl.BlockSpec((C, 1), lambda n: (0, 0)),              # conv bias
                pl.BlockSpec((1, BHW), lambda n: (0, 0)),            # gamma (tiled)
                pl.BlockSpec((1, BHW), lambda n: (0, 0)),            # beta (tiled)
                pl.BlockSpec((8, HW), lambda n: (0, 0)),             # boundary masks
                pl.BlockSpec((Bt * H, BHW), lambda n: (0, 0)),       # poolt
            ],
            out_specs=pl.BlockSpec((Bt * C, HW), lambda n: (n, 0)),
            scratch_shapes=[pltpu.VMEM((9 * 2 * C, BHW), jnp.bfloat16)],  # im2col slab
        ),
        compiler_params=pltpu.CompilerParams(
            dimension_semantics=("parallel",)),
    )(x1f, x2f, rt, wmat, bcol, gamma_full, beta_full, masks, poolt)

    return out.reshape(N, C, H, W)


def _bilinear_resize_align_corners(x, Ho, Wo):
    """F.interpolate(x, size=(Ho, Wo), mode='bilinear', align_corners=True), NCHW."""
    N, C, H, W = x.shape
    if (Ho, Wo) == (H, W):
        return x

    def src(n_out, n_in):
        if n_out == 1:
            return jnp.zeros((n_out,), jnp.float32)
        return jnp.arange(n_out, dtype=jnp.float32) * ((n_in - 1) / (n_out - 1))

    ys, xs = src(Ho, H), src(Wo, W)
    y0 = jnp.floor(ys).astype(jnp.int32)
    x0 = jnp.floor(xs).astype(jnp.int32)
    y1 = jnp.minimum(y0 + 1, H - 1)
    x1 = jnp.minimum(x0 + 1, W - 1)
    wy = (ys - y0.astype(jnp.float32))[None, None, :, None]
    wx = (xs - x0.astype(jnp.float32))[None, None, None, :]
    g00 = x[:, :, y0][:, :, :, x0]
    g01 = x[:, :, y0][:, :, :, x1]
    g10 = x[:, :, y1][:, :, :, x0]
    g11 = x[:, :, y1][:, :, :, x1]
    top = g00 * (1.0 - wx) + g01 * wx
    bot = g10 * (1.0 - wx) + g11 * wx
    return top * (1.0 - wy) + bot * wy


def _ref_forward(x1, x2, params, eps=1e-5):
    """Pure-JAX f32 reference matching the PyTorch FusionBlock."""
    w, b, gamma, beta = params
    N, C, H, W = x1.shape
    x2u = _bilinear_resize_align_corners(x2.astype(jnp.float32), H, W)
    xc = jnp.concatenate([x1.astype(jnp.float32), x2u], axis=1)
    y = lax.conv_general_dilated(xc, w, (1, 1), 'SAME',
                                 dimension_numbers=('NCHW', 'OIHW', 'NCHW'),
                                 precision=lax.Precision.HIGHEST)
    y = y + b[None, :, None, None]
    # nn.LayerNorm(C) on an NCHW tensor normalizes the trailing (W) axis.
    mean = jnp.mean(y, axis=-1, keepdims=True)
    var = jnp.mean((y - mean) ** 2, axis=-1, keepdims=True)
    y = (y - mean) * lax.rsqrt(var + eps)
    return y * gamma[None, None, None, :] + beta[None, None, None, :]


if __name__ == "__main__":
    key = jax.random.PRNGKey(0)
    # W must equal channels for nn.LayerNorm(channels) on NCHW to be well-formed.
    N, C, H, W = 4, 16, 16, 16
    H2, W2 = 8, 8
    ks = jax.random.split(key, 6)

    x1 = jax.random.normal(ks[0], (N, C, H, W), jnp.float32)
    x2 = jax.random.normal(ks[1], (N, C, H2, W2), jnp.float32)

    fan_in = 2 * C * 3 * 3                 # PyTorch-style U(-1/sqrt(fan_in), ...)
    bound = 1.0 / math.sqrt(fan_in)
    w = jax.random.uniform(ks[2], (C, 2 * C, 3, 3), jnp.float32, -bound, bound)
    b = jax.random.uniform(ks[3], (C,), jnp.float32, -bound, bound)
    gamma = 1.0 + 0.1 * jax.random.normal(ks[4], (C,), jnp.float32)
    beta = 0.1 * jax.random.normal(ks[5], (C,), jnp.float32)
    params = (w, b, gamma, beta)

    out = jax.block_until_ready(fusion_block(x1, x2, params))
    assert out.shape == (N, C, H, W)

    ref = _ref_forward(x1, x2, params)
    # bf16 MXU operands (f32 accumulate / f32 LN) -> half-precision-level tolerance.
    np.testing.assert_allclose(np.asarray(out), np.asarray(ref),
                               rtol=5e-2, atol=5e-2)
    print("KERNEL_OK")
</pallas_src>

<mosaic_0001>
module attributes {stable_mosaic.version = 11 : i64} {
  func.func @_fusion_kernel(%arg0: i32, %arg1: memref<32x256xf32, #tpu.memory_space<vmem>>, %arg2: memref<32x64xf32, #tpu.memory_space<vmem>>, %arg3: memref<64x256xf32, #tpu.memory_space<vmem>>, %arg4: memref<16x288xbf16, #tpu.memory_space<vmem>>, %arg5: memref<16x1xf32, #tpu.memory_space<vmem>>, %arg6: memref<1x512xf32, #tpu.memory_space<vmem>>, %arg7: memref<1x512xf32, #tpu.memory_space<vmem>>, %arg8: memref<8x256xf32, #tpu.memory_space<vmem>>, %arg9: memref<32x512xf32, #tpu.memory_space<vmem>>, %arg10: memref<32x256xf32, #tpu.memory_space<vmem>>, %arg11: memref<288x512xbf16, #tpu.memory_space<vmem>>) attributes {dimension_semantics = [#tpu.dimension_semantics<parallel>], iteration_bounds = array<i64: 2>, scalar_prefetch = 0 : i64, scratch_operands = 1 : i64, tpu.core_type = #tpu.core_type<tc>, window_params = [{transform_indices = @transform_0, window_bounds = array<i64: 32, 256>}, {transform_indices = @transform_1, window_bounds = array<i64: 32, 64>}, {pipeline_mode = #tpu.pipeline_mode<synchronous>, transform_indices = @transform_2, window_bounds = array<i64: 64, 256>}, {pipeline_mode = #tpu.pipeline_mode<synchronous>, transform_indices = @transform_3, window_bounds = array<i64: 16, 288>}, {pipeline_mode = #tpu.pipeline_mode<synchronous>, transform_indices = @transform_4, window_bounds = array<i64: 16, 1>}, {pipeline_mode = #tpu.pipeline_mode<synchronous>, transform_indices = @transform_5, window_bounds = array<i64: 1, 512>}, {pipeline_mode = #tpu.pipeline_mode<synchronous>, transform_indices = @transform_6, window_bounds = array<i64: 1, 512>}, {pipeline_mode = #tpu.pipeline_mode<synchronous>, transform_indices = @transform_7, window_bounds = array<i64: 8, 256>}, {pipeline_mode = #tpu.pipeline_mode<synchronous>, transform_indices = @transform_8, window_bounds = array<i64: 32, 512>}, {transform_indices = @transform_9, window_bounds = array<i64: 32, 256>}]} {
    %c0 = arith.constant 0 : index
    %c0_0 = arith.constant 0 : index
    %0 = vector.load %arg2[%c0, %c0_0] : memref<32x64xf32, #tpu.memory_space<vmem>>, vector<32x64xf32>
    %c0_1 = arith.constant 0 : index
    %c0_2 = arith.constant 0 : index
    %1 = vector.load %arg3[%c0_1, %c0_2] : memref<64x256xf32, #tpu.memory_space<vmem>>, vector<64x256xf32>
    %cst = arith.constant dense<0.000000e+00> : vector<32x256xf32>
    %2 = tpu.matmul %0, %1, %cst {dimension_numbers = #tpu.dot_dimension_numbers<[1], [0], [0], [1], [0, 0, 1, 1], [], []>} : vector<32x64xf32>, vector<64x256xf32>, vector<32x256xf32> -> vector<32x256xf32>
    %c0_3 = arith.constant 0 : index
    %c0_4 = arith.constant 0 : index
    %3 = vector.load %arg1[%c0_3, %c0_4] : memref<32x256xf32, #tpu.memory_space<vmem>>, vector<16x256xf32>
    %c16 = arith.constant 16 : index
    %c0_5 = arith.constant 0 : index
    %4 = vector.load %arg1[%c16, %c0_5] : memref<32x256xf32, #tpu.memory_space<vmem>>, vector<16x256xf32>
    %5 = vector.extract_strided_slice %2 {offsets = [0, 0], sizes = [16, 256], strides = [1, 1]} : vector<32x256xf32> to vector<16x256xf32>
    %6 = vector.extract_strided_slice %2 {offsets = [16, 0], sizes = [16, 256], strides = [1, 1]} : vector<32x256xf32> to vector<16x256xf32>
    %c0_6 = arith.constant 0 : index
    %c0_7 = arith.constant 0 : index
    %7 = vector.load %arg8[%c0_6, %c0_7] : memref<8x256xf32, #tpu.memory_space<vmem>>, vector<1x256xf32>
    %8 = vector.shape_cast %7 : vector<1x256xf32> to vector<1x256xf32>
    %9 = vector.broadcast %8 : vector<1x256xf32> to vector<16x256xf32>
    %c17_i32 = arith.constant 17 : i32
    %10 = tpu.dynamic_rotate %3 by %c17_i32 dim 1 : vector<16x256xf32>, i32 -> vector<16x256xf32>
    %11 = arith.mulf %10, %9 : vector<16x256xf32>
    %c17_i32_8 = arith.constant 17 : i32
    %12 = tpu.dynamic_rotate %5 by %c17_i32_8 dim 1 : vector<16x256xf32>, i32 -> vector<16x256xf32>
    %13 = arith.mulf %12, %9 : vector<16x256xf32>
    %14 = arith.truncf %11 : vector<16x256xf32> to vector<16x256xbf16>
    %c0_9 = arith.constant 0 : index
    %c0_10 = arith.constant 0 : index
    %15 = vector.load %arg11[%c0_9, %c0_10] : memref<288x512xbf16, #tpu.memory_space<vmem>>, vector<16x256xbf16>
    tpu.vector_store %arg11[%c0_9, %c0_10], %14 {strides = array<i32>} : memref<288x512xbf16, #tpu.memory_space<vmem>>, vector<16x256xbf16>,
    %16 = arith.truncf %13 : vector<16x256xf32> to vector<16x256xbf16>
    %c16_11 = arith.constant 16 : index
    %c0_12 = arith.constant 0 : index
    %17 = vector.load %arg11[%c16_11, %c0_12] : memref<288x512xbf16, #tpu.memory_space<vmem>>, vector<16x256xbf16>
    tpu.vector_store %arg11[%c16_11, %c0_12], %16 {strides = array<i32>} : memref<288x512xbf16, #tpu.memory_space<vmem>>, vector<16x256xbf16>,
    %c17_i32_13 = arith.constant 17 : i32
    %18 = tpu.dynamic_rotate %4 by %c17_i32_13 dim 1 : vector<16x256xf32>, i32 -> vector<16x256xf32>
    %19 = arith.mulf %18, %9 : vector<16x256xf32>
    %c17_i32_14 = arith.constant 17 : i32
    %20 = tpu.dynamic_rotate %6 by %c17_i32_14 dim 1 : vector<16x256xf32>, i32 -> vector<16x256xf32>
    %21 = arith.mulf %20, %9 : vector<16x256xf32>
    %22 = arith.truncf %19 : vector<16x256xf32> to vector<16x256xbf16>
    %c0_15 = arith.constant 0 : index
    %c256 = arith.constant 256 : index
    %23 = vector.load %arg11[%c0_15, %c256] : memref<288x512xbf16, #tpu.memory_space<vmem>>, vector<16x256xbf16>
    tpu.vector_store %arg11[%c0_15, %c256], %22 {strides = array<i32>} : memref<288x512xbf16, #tpu.memory_space<vmem>>, vector<16x256xbf16>,
    %24 = arith.truncf %21 : vector<16x256xf32> to vector<16x256xbf16>
    %c16_16 = arith.constant 16 : index
    %c256_17 = arith.constant 256 : index
    %25 = vector.load %arg11[%c16_16, %c256_17] : memref<288x512xbf16, #tpu.memory_space<vmem>>, vector<16x256xbf16>
    tpu.vector_store %arg11[%c16_16, %c256_17], %24 {strides = array<i32>} : memref<288x512xbf16, #tpu.memory_space<vmem>>, vector<16x256xbf16>,
    %c1 = arith.constant 1 : index
    %c0_18 = arith.constant 0 : index
    %26 = vector.load %arg8[%c1, %c0_18] : memref<8x256xf32, #tpu.memory_space<vmem>>, vector<1x256xf32>
    %27 = vector.shape_cast %26 : vector<1x256xf32> to vector<1x256xf32>
    %28 = vector.broadcast %27 : vector<1x256xf32> to vector<16x256xf32>
    %c16_i32 = arith.constant 16 : i32
    %29 = tpu.dynamic_rotate %3 by %c16_i32 dim 1 : vector<16x256xf32>, i32 -> vector<16x256xf32>
    %30 = arith.mulf %29, %28 : vector<16x256xf32>
    %c16_i32_19 = arith.constant 16 : i32
    %31 = tpu.dynamic_rotate %5 by %c16_i32_19 dim 1 : vector<16x256xf32>, i32 -> vector<16x256xf32>
    %32 = arith.mulf %31, %28 : vector<16x256xf32>
    %33 = arith.truncf %30 : vector<16x256xf32> to vector<16x256xbf16>
    %c32 = arith.constant 32 : index
    %c0_20 = arith.constant 0 : index
    %34 = vector.load %arg11[%c32, %c0_20] : memref<288x512xbf16, #tpu.memory_space<vmem>>, vector<16x256xbf16>
    tpu.vector_store %arg11[%c32, %c0_20], %33 {strides = array<i32>} : memref<288x512xbf16, #tpu.memory_space<vmem>>, vector<16x256xbf16>,
    %35 = arith.truncf %32 : vector<16x256xf32> to vector<16x256xbf16>
    %c48 = arith.constant 48 : index
    %c0_21 = arith.constant 0 : index
    %36 = vector.load %arg11[%c48, %c0_21] : memref<288x512xbf16, #tpu.memory_space<vmem>>, vector<16x256xbf16>
    tpu.vector_store %arg11[%c48, %c0_21], %35 {strides = array<i32>} : memref<288x512xbf16, #tpu.memory_space<vmem>>, vector<16x256xbf16>,
    %c16_i32_22 = arith.constant 16 : i32
    %37 = tpu.dynamic_rotate %4 by %c16_i32_22 dim 1 : vector<16x256xf32>, i32 -> vector<16x256xf32>
    %38 = arith.mulf %37, %28 : vector<16x256xf32>
    %c16_i32_23 = arith.constant 16 : i32
    %39 = tpu.dynamic_rotate %6 by %c16_i32_23 dim 1 : vector<16x256xf32>, i32 -> vector<16x256xf32>
    %40 = arith.mulf %39, %28 : vector<16x256xf32>
    %41 = arith.truncf %38 : vector<16x256xf32> to vector<16x256xbf16>
    %c32_24 = arith.constant 32 : index
    %c256_25 = arith.constant 256 : index
    %42 = vector.load %arg11[%c32_24, %c256_25] : memref<288x512xbf16, #tpu.memory_space<vmem>>, vector<16x256xbf16>
    tpu.vector_store %arg11[%c32_24, %c256_25], %41 {strides = array<i32>} : memref<288x512xbf16, #tpu.memory_space<vmem>>, vector<16x256xbf16>,
    %43 = arith.truncf %40 : vector<16x256xf32> to vector<16x256xbf16>
    %c48_26 = arith.constant 48 : index
    %c256_27 = arith.constant 256 : index
    %44 = vector.load %arg11[%c48_26, %c256_27] : memref<288x512xbf16, #tpu.memory_space<vmem>>, vector<16x256xbf16>
    tpu.vector_store %arg11[%c48_26, %c256_27], %43 {strides = array<i32>} : memref<288x512xbf16, #tpu.memory_space<vmem>>, vector<16x256xbf16>,
    %c2 = arith.constant 2 : index
    %c0_28 = arith.constant 0 : index
    %45 = vector.load %arg8[%c2, %c0_28] : memref<8x256xf32, #tpu.memory_space<vmem>>, vector<1x256xf32>
    %46 = vector.shape_cast %45 : vector<1x256xf32> to vector<1x256xf32>
    %47 = vector.broadcast %46 : vector<1x256xf32> to vector<16x256xf32>
    %c15_i32 = arith.constant 15 : i32
    %48 = tpu.dynamic_rotate %3 by %c15_i32 dim 1 : vector<16x256xf32>, i32 -> vector<16x256xf32>
    %49 = arith.mulf %48, %47 : vector<16x256xf32>
    %c15_i32_29 = arith.constant 15 : i32
    %50 = tpu.dynamic_rotate %5 by %c15_i32_29 dim 1 : vector<16x256xf32>, i32 -> vector<16x256xf32>
    %51 = arith.mulf %50, %47 : vector<16x256xf32>
    %52 = arith.truncf %49 : vector<16x256xf32> to vector<16x256xbf16>
    %c64 = arith.constant 64 : index
    %c0_30 = arith.constant 0 : index
    %53 = vector.load %arg11[%c64, %c0_30] : memref<288x512xbf16, #tpu.memory_space<vmem>>, vector<16x256xbf16>
    tpu.vector_store %arg11[%c64, %c0_30], %52 {strides = array<i32>} : memref<288x512xbf16, #tpu.memory_space<vmem>>, vector<16x256xbf16>,
    %54 = arith.truncf %51 : vector<16x256xf32> to vector<16x256xbf16>
    %c80 = arith.constant 80 : index
    %c0_31 = arith.constant 0 : index
    %55 = vector.load %arg11[%c80, %c0_31] : memref<288x512xbf16, #tpu.memory_space<vmem>>, vector<16x256xbf16>
    tpu.vector_store %arg11[%c80, %c0_31], %54 {strides = array<i32>} : memref<288x512xbf16, #tpu.memory_space<vmem>>, vector<16x256xbf16>,
    %c15_i32_32 = arith.constant 15 : i32
    %56 = tpu.dynamic_rotate %4 by %c15_i32_32 dim 1 : vector<16x256xf32>, i32 -> vector<16x256xf32>
    %57 = arith.mulf %56, %47 : vector<16x256xf32>
    %c15_i32_33 = arith.constant 15 : i32
    %58 = tpu.dynamic_rotate %6 by %c15_i32_33 dim 1 : vector<16x256xf32>, i32 -> vector<16x256xf32>
    %59 = arith.mulf %58, %47 : vector<16x256xf32>
    %60 = arith.truncf %57 : vector<16x256xf32> to vector<16x256xbf16>
    %c64_34 = arith.constant 64 : index
    %c256_35 = arith.constant 256 : index
    %61 = vector.load %arg11[%c64_34, %c256_35] : memref<288x512xbf16, #tpu.memory_space<vmem>>, vector<16x256xbf16>
    tpu.vector_store %arg11[%c64_34, %c256_35], %60 {strides = array<i32>} : memref<288x512xbf16, #tpu.memory_space<vmem>>, vector<16x256xbf16>,
    %62 = arith.truncf %59 : vector<16x256xf32> to vector<16x256xbf16>
    %c80_36 = arith.constant 80 : index
    %c256_37 = arith.constant 256 : index
    %63 = vector.load %arg11[%c80_36, %c256_37] : memref<288x512xbf16, #tpu.memory_space<vmem>>, vector<16x256xbf16>
    tpu.vector_store %arg11[%c80_36, %c256_37], %62 {strides = array<i32>} : memref<288x512xbf16, #tpu.memory_space<vmem>>, vector<16x256xbf16>,
    %c3 = arith.constant 3 : index
    %c0_38 = arith.constant 0 : index
    %64 = vector.load %arg8[%c3, %c0_38] : memref<8x256xf32, #tpu.memory_space<vmem>>, vector<1x256xf32>
    %65 = vector.shape_cast %64 : vector<1x256xf32> to vector<1x256xf32>
    %66 = vector.broadcast %65 : vector<1x256xf32> to vector<16x256xf32>
    %c1_i32 = arith.constant 1 : i32
    %67 = tpu.dynamic_rotate %3 by %c1_i32 dim 1 : vector<16x256xf32>, i32 -> vector<16x256xf32>
    %68 = arith.mulf %67, %66 : vector<16x256xf32>
    %c1_i32_39 = arith.constant 1 : i32
    %69 = tpu.dynamic_rotate %5 by %c1_i32_39 dim 1 : vector<16x256xf32>, i32 -> vector<16x256xf32>
    %70 = arith.mulf %69, %66 : vector<16x256xf32>
    %71 = arith.truncf %68 : vector<16x256xf32> to vector<16x256xbf16>
    %c96 = arith.constant 96 : index
    %c0_40 = arith.constant 0 : index
    %72 = vector.load %arg11[%c96, %c0_40] : memref<288x512xbf16, #tpu.memory_space<vmem>>, vector<16x256xbf16>
    tpu.vector_store %arg11[%c96, %c0_40], %71 {strides = array<i32>} : memref<288x512xbf16, #tpu.memory_space<vmem>>, vector<16x256xbf16>,
    %73 = arith.truncf %70 : vector<16x256xf32> to vector<16x256xbf16>
    %c112 = arith.constant 112 : index
    %c0_41 = arith.constant 0 : index
    %74 = vector.load %arg11[%c112, %c0_41] : memref<288x512xbf16, #tpu.memory_space<vmem>>, vector<16x256xbf16>
    tpu.vector_store %arg11[%c112, %c0_41], %73 {strides = array<i32>} : memref<288x512xbf16, #tpu.memory_space<vmem>>, vector<16x256xbf16>,
    %c1_i32_42 = arith.constant 1 : i32
    %75 = tpu.dynamic_rotate %4 by %c1_i32_42 dim 1 : vector<16x256xf32>, i32 -> vector<16x256xf32>
    %76 = arith.mulf %75, %66 : vector<16x256xf32>
    %c1_i32_43 = arith.constant 1 : i32
    %77 = tpu.dynamic_rotate %6 by %c1_i32_43 dim 1 : vector<16x256xf32>, i32 -> vector<16x256xf32>
    %78 = arith.mulf %77, %66 : vector<16x256xf32>
    %79 = arith.truncf %76 : vector<16x256xf32> to vector<16x256xbf16>
    %c96_44 = arith.constant 96 : index
    %c256_45 = arith.constant 256 : index
    %80 = vector.load %arg11[%c96_44, %c256_45] : memref<288x512xbf16, #tpu.memory_space<vmem>>, vector<16x256xbf16>
    tpu.vector_store %arg11[%c96_44, %c256_45], %79 {strides = array<i32>} : memref<288x512xbf16, #tpu.memory_space<vmem>>, vector<16x256xbf16>,
    %81 = arith.truncf %78 : vector<16x256xf32> to vector<16x256xbf16>
    %c112_46 = arith.constant 112 : index
    %c256_47 = arith.constant 256 : index
    %82 = vector.load %arg11[%c112_46, %c256_47] : memref<288x512xbf16, #tpu.memory_space<vmem>>, vector<16x256xbf16>
    tpu.vector_store %arg11[%c112_46, %c256_47], %81 {strides = array<i32>} : memref<288x512xbf16, #tpu.memory_space<vmem>>, vector<16x256xbf16>,
    %83 = arith.truncf %3 : vector<16x256xf32> to vector<16x256xbf16>
    %c128 = arith.constant 128 : index
    %c0_48 = arith.constant 0 : index
    %84 = vector.load %arg11[%c128, %c0_48] : memref<288x512xbf16, #tpu.memory_space<vmem>>, vector<16x256xbf16>
    tpu.vector_store %arg11[%c128, %c0_48], %83 {strides = array<i32>} : memref<288x512xbf16, #tpu.memory_space<vmem>>, vector<16x256xbf16>,
    %85 = arith.truncf %5 : vector<16x256xf32> to vector<16x256xbf16>
    %c144 = arith.constant 144 : index
    %c0_49 = arith.constant 0 : index
    %86 = vector.load %arg11[%c144, %c0_49] : memref<288x512xbf16, #tpu.memory_space<vmem>>, vector<16x256xbf16>
    tpu.vector_store %arg11[%c144, %c0_49], %85 {strides = array<i32>} : memref<288x512xbf16, #tpu.memory_space<vmem>>, vector<16x256xbf16>,
    %87 = arith.truncf %4 : vector<16x256xf32> to vector<16x256xbf16>
    %c128_50 = arith.constant 128 : index
    %c256_51 = arith.constant 256 : index
    %88 = vector.load %arg11[%c128_50, %c256_51] : memref<288x512xbf16, #tpu.memory_space<vmem>>, vector<16x256xbf16>
    tpu.vector_store %arg11[%c128_50, %c256_51], %87 {strides = array<i32>} : memref<288x512xbf16, #tpu.memory_space<vmem>>, vector<16x256xbf16>,
    %89 = arith.truncf %6 : vector<16x256xf32> to vector<16x256xbf16>
    %c144_52 = arith.constant 144 : index
    %c256_53 = arith.constant 256 : index
    %90 = vector.load %arg11[%c144_52, %c256_53] : memref<288x512xbf16, #tpu.memory_space<vmem>>, vector<16x256xbf16>
    tpu.vector_store %arg11[%c144_52, %c256_53], %89 {strides = array<i32>} : memref<288x512xbf16, #tpu.memory_space<vmem>>, vector<16x256xbf16>,
    %c4 = arith.constant 4 : index
    %c0_54 = arith.constant 0 : index
    %91 = vector.load %arg8[%c4, %c0_54] : memref<8x256xf32, #tpu.memory_space<vmem>>, vector<1x256xf32>
    %92 = vector.shape_cast %91 : vector<1x256xf32> to vector<1x256xf32>
    %93 = vector.broadcast %92 : vector<1x256xf32> to vector<16x256xf32>
    %c255_i32 = arith.constant 255 : i32
    %94 = tpu.dynamic_rotate %3 by %c255_i32 dim 1 : vector<16x256xf32>, i32 -> vector<16x256xf32>
    %95 = arith.mulf %94, %93 : vector<16x256xf32>
    %c255_i32_55 = arith.constant 255 : i32
    %96 = tpu.dynamic_rotate %5 by %c255_i32_55 dim 1 : vector<16x256xf32>, i32 -> vector<16x256xf32>
    %97 = arith.mulf %96, %93 : vector<16x256xf32>
    %98 = arith.truncf %95 : vector<16x256xf32> to vector<16x256xbf16>
    %c160 = arith.constant 160 : index
    %c0_56 = arith.constant 0 : index
    %99 = vector.load %arg11[%c160, %c0_56] : memref<288x512xbf16, #tpu.memory_space<vmem>>, vector<16x256xbf16>
    tpu.vector_store %arg11[%c160, %c0_56], %98 {strides = array<i32>} : memref<288x512xbf16, #tpu.memory_space<vmem>>, vector<16x256xbf16>,
    %100 = arith.truncf %97 : vector<16x256xf32> to vector<16x256xbf16>
    %c176 = arith.constant 176 : index
    %c0_57 = arith.constant 0 : index
    %101 = vector.load %arg11[%c176, %c0_57] : memref<288x512xbf16, #tpu.memory_space<vmem>>, vector<16x256xbf16>
    tpu.vector_store %arg11[%c176, %c0_57], %100 {strides = array<i32>} : memref<288x512xbf16, #tpu.memory_space<vmem>>, vector<16x256xbf16>,
    %c255_i32_58 = arith.constant 255 : i32
    %102 = tpu.dynamic_rotate %4 by %c255_i32_58 dim 1 : vector<16x256xf32>, i32 -> vector<16x256xf32>
    %103 = arith.mulf %102, %93 : vector<16x256xf32>
    %c255_i32_59 = arith.constant 255 : i32
    %104 = tpu.dynamic_rotate %6 by %c255_i32_59 dim 1 : vector<16x256xf32>, i32 -> vector<16x256xf32>
    %105 = arith.mulf %104, %93 : vector<16x256xf32>
    %106 = arith.truncf %103 : vector<16x256xf32> to vector<16x256xbf16>
    %c160_60 = arith.constant 160 : index
    %c256_61 = arith.constant 256 : index
    %107 = vector.load %arg11[%c160_60, %c256_61] : memref<288x512xbf16, #tpu.memory_space<vmem>>, vector<16x256xbf16>
    tpu.vector_store %arg11[%c160_60, %c256_61], %106 {strides = array<i32>} : memref<288x512xbf16, #tpu.memory_space<vmem>>, vector<16x256xbf16>,
    %108 = arith.truncf %105 : vector<16x256xf32> to vector<16x256xbf16>
    %c176_62 = arith.constant 176 : index
    %c256_63 = arith.constant 256 : index
    %109 = vector.load %arg11[%c176_62, %c256_63] : memref<288x512xbf16, #tpu.memory_space<vmem>>, vector<16x256xbf16>
    tpu.vector_store %arg11[%c176_62, %c256_63], %108 {strides = array<i32>} : memref<288x512xbf16, #tpu.memory_space<vmem>>, vector<16x256xbf16>,
    %c5 = arith.constant 5 : index
    %c0_64 = arith.constant 0 : index
    %110 = vector.load %arg8[%c5, %c0_64] : memref<8x256xf32, #tpu.memory_space<vmem>>, vector<1x256xf32>
    %111 = vector.shape_cast %110 : vector<1x256xf32> to vector<1x256xf32>
    %112 = vector.broadcast %111 : vector<1x256xf32> to vector<16x256xf32>
    %c241_i32 = arith.constant 241 : i32
    %113 = tpu.dynamic_rotate %3 by %c241_i32 dim 1 : vector<16x256xf32>, i32 -> vector<16x256xf32>
    %114 = arith.mulf %113, %112 : vector<16x256xf32>
    %c241_i32_65 = arith.constant 241 : i32
    %115 = tpu.dynamic_rotate %5 by %c241_i32_65 dim 1 : vector<16x256xf32>, i32 -> vector<16x256xf32>
    %116 = arith.mulf %115, %112 : vector<16x256xf32>
    %117 = arith.truncf %114 : vector<16x256xf32> to vector<16x256xbf16>
    %c192 = arith.constant 192 : index
    %c0_66 = arith.constant 0 : index
    %118 = vector.load %arg11[%c192, %c0_66] : memref<288x512xbf16, #tpu.memory_space<vmem>>, vector<16x256xbf16>
    tpu.vector_store %arg11[%c192, %c0_66], %117 {strides = array<i32>} : memref<288x512xbf16, #tpu.memory_space<vmem>>, vector<16x256xbf16>,
    %119 = arith.truncf %116 : vector<16x256xf32> to vector<16x256xbf16>
    %c208 = arith.constant 208 : index
    %c0_67 = arith.constant 0 : index
    %120 = vector.load %arg11[%c208, %c0_67] : memref<288x512xbf16, #tpu.memory_space<vmem>>, vector<16x256xbf16>
    tpu.vector_store %arg11[%c208, %c0_67], %119 {strides = array<i32>} : memref<288x512xbf16, #tpu.memory_space<vmem>>, vector<16x256xbf16>,
    %c241_i32_68 = arith.constant 241 : i32
    %121 = tpu.dynamic_rotate %4 by %c241_i32_68 dim 1 : vector<16x256xf32>, i32 -> vector<16x256xf32>
    %122 = arith.mulf %121, %112 : vector<16x256xf32>
    %c241_i32_69 = arith.constant 241 : i32
    %123 = tpu.dynamic_rotate %6 by %c241_i32_69 dim 1 : vector<16x256xf32>, i32 -> vector<16x256xf32>
    %124 = arith.mulf %123, %112 : vector<16x256xf32>
    %125 = arith.truncf %122 : vector<16x256xf32> to vector<16x256xbf16>
    %c192_70 = arith.constant 192 : index
    %c256_71 = arith.constant 256 : index
    %126 = vector.load %arg11[%c192_70, %c256_71] : memref<288x512xbf16, #tpu.memory_space<vmem>>, vector<16x256xbf16>
    tpu.vector_store %arg11[%c192_70, %c256_71], %125 {strides = array<i32>} : memref<288x512xbf16, #tpu.memory_space<vmem>>, vector<16x256xbf16>,
    %127 = arith.truncf %124 : vector<16x256xf32> to vector<16x256xbf16>
    %c208_72 = arith.constant 208 : index
    %c256_73 = arith.constant 256 : index
    %128 = vector.load %arg11[%c208_72, %c256_73] : memref<288x512xbf16, #tpu.memory_space<vmem>>, vector<16x256xbf16>
    tpu.vector_store %arg11[%c208_72, %c256_73], %127 {strides = array<i32>} : memref<288x512xbf16, #tpu.memory_space<vmem>>, vector<16x256xbf16>,
    %c6 = arith.constant 6 : index
    %c0_74 = arith.constant 0 : index
    %129 = vector.load %arg8[%c6, %c0_74] : memref<8x256xf32, #tpu.memory_space<vmem>>, vector<1x256xf32>
    %130 = vector.shape_cast %129 : vector<1x256xf32> to vector<1x256xf32>
    %131 = vector.broadcast %130 : vector<1x256xf32> to vector<16x256xf32>
    %c240_i32 = arith.constant 240 : i32
    %132 = tpu.dynamic_rotate %3 by %c240_i32 dim 1 : vector<16x256xf32>, i32 -> vector<16x256xf32>
    %133 = arith.mulf %132, %131 : vector<16x256xf32>
    %c240_i32_75 = arith.constant 240 : i32
    %134 = tpu.dynamic_rotate %5 by %c240_i32_75 dim 1 : vector<16x256xf32>, i32 -> vector<16x256xf32>
    %135 = arith.mulf %134, %131 : vector<16x256xf32>
    %136 = arith.truncf %133 : vector<16x256xf32> to vector<16x256xbf16>
    %c224 = arith.constant 224 : index
    %c0_76 = arith.constant 0 : index
    %137 = vector.load %arg11[%c224, %c0_76] : memref<288x512xbf16, #tpu.memory_space<vmem>>, vector<16x256xbf16>
    tpu.vector_store %arg11[%c224, %c0_76], %136 {strides = array<i32>} : memref<288x512xbf16, #tpu.memory_space<vmem>>, vector<16x256xbf16>,
    %138 = arith.truncf %135 : vector<16x256xf32> to vector<16x256xbf16>
    %c240 = arith.constant 240 : index
    %c0_77 = arith.constant 0 : index
    %139 = vector.load %arg11[%c240, %c0_77] : memref<288x512xbf16, #tpu.memory_space<vmem>>, vector<16x256xbf16>
    tpu.vector_store %arg11[%c240, %c0_77], %138 {strides = array<i32>} : memref<288x512xbf16, #tpu.memory_space<vmem>>, vector<16x256xbf16>,
    %c240_i32_78 = arith.constant 240 : i32
    %140 = tpu.dynamic_rotate %4 by %c240_i32_78 dim 1 : vector<16x256xf32>, i32 -> vector<16x256xf32>
    %141 = arith.mulf %140, %131 : vector<16x256xf32>
    %c240_i32_79 = arith.constant 240 : i32
    %142 = tpu.dynamic_rotate %6 by %c240_i32_79 dim 1 : vector<16x256xf32>, i32 -> vector<16x256xf32>
    %143 = arith.mulf %142, %131 : vector<16x256xf32>
    %144 = arith.truncf %141 : vector<16x256xf32> to vector<16x256xbf16>
    %c224_80 = arith.constant 224 : index
    %c256_81 = arith.constant 256 : index
    %145 = vector.load %arg11[%c224_80, %c256_81] : memref<288x512xbf16, #tpu.memory_space<vmem>>, vector<16x256xbf16>
    tpu.vector_store %arg11[%c224_80, %c256_81], %144 {strides = array<i32>} : memref<288x512xbf16, #tpu.memory_space<vmem>>, vector<16x256xbf16>,
    %146 = arith.truncf %143 : vector<16x256xf32> to vector<16x256xbf16>
    %c240_82 = arith.constant 240 : index
    %c256_83 = arith.constant 256 : index
    %147 = vector.load %arg11[%c240_82, %c256_83] : memref<288x512xbf16, #tpu.memory_space<vmem>>, vector<16x256xbf16>
    tpu.vector_store %arg11[%c240_82, %c256_83], %146 {strides = array<i32>} : memref<288x512xbf16, #tpu.memory_space<vmem>>, vector<16x256xbf16>,
    %c7 = arith.constant 7 : index
    %c0_84 = arith.constant 0 : index
    %148 = vector.load %arg8[%c7, %c0_84] : memref<8x256xf32, #tpu.memory_space<vmem>>, vector<1x256xf32>
    %149 = vector.shape_cast %148 : vector<1x256xf32> to vector<1x256xf32>
    %150 = vector.broadcast %149 : vector<1x256xf32> to vector<16x256xf32>
    %c239_i32 = arith.constant 239 : i32
    %151 = tpu.dynamic_rotate %3 by %c239_i32 dim 1 : vector<16x256xf32>, i32 -> vector<16x256xf32>
    %152 = arith.mulf %151, %150 : vector<16x256xf32>
    %c239_i32_85 = arith.constant 239 : i32
    %153 = tpu.dynamic_rotate %5 by %c239_i32_85 dim 1 : vector<16x256xf32>, i32 -> vector<16x256xf32>
    %154 = arith.mulf %153, %150 : vector<16x256xf32>
    %155 = arith.truncf %152 : vector<16x256xf32> to vector<16x256xbf16>
    %c256_86 = arith.constant 256 : index
    %c0_87 = arith.constant 0 : index
    %156 = vector.load %arg11[%c256_86, %c0_87] : memref<288x512xbf16, #tpu.memory_space<vmem>>, vector<16x256xbf16>
    tpu.vector_store %arg11[%c256_86, %c0_87], %155 {strides = array<i32>} : memref<288x512xbf16, #tpu.memory_space<vmem>>, vector<16x256xbf16>,
    %157 = arith.truncf %154 : vector<16x256xf32> to vector<16x256xbf16>
    %c272 = arith.constant 272 : index
    %c0_88 = arith.constant 0 : index
    %158 = vector.load %arg11[%c272, %c0_88] : memref<288x512xbf16, #tpu.memory_space<vmem>>, vector<16x256xbf16>
    tpu.vector_store %arg11[%c272, %c0_88], %157 {strides = array<i32>} : memref<288x512xbf16, #tpu.memory_space<vmem>>, vector<16x256xbf16>,
    %c239_i32_89 = arith.constant 239 : i32
    %159 = tpu.dynamic_rotate %4 by %c239_i32_89 dim 1 : vector<16x256xf32>, i32 -> vector<16x256xf32>
    %160 = arith.mulf %159, %150 : vector<16x256xf32>
    %c239_i32_90 = arith.constant 239 : i32
    %161 = tpu.dynamic_rotate %6 by %c239_i32_90 dim 1 : vector<16x256xf32>, i32 -> vector<16x256xf32>
    %162 = arith.mulf %161, %150 : vector<16x256xf32>
    %163 = arith.truncf %160 : vector<16x256xf32> to vector<16x256xbf16>
    %c256_91 = arith.constant 256 : index
    %c256_92 = arith.constant 256 : index
    %164 = vector.load %arg11[%c256_91, %c256_92] : memref<288x512xbf16, #tpu.memory_space<vmem>>, vector<16x256xbf16>
    tpu.vector_store %arg11[%c256_91, %c256_92], %163 {strides = array<i32>} : memref<288x512xbf16, #tpu.memory_space<vmem>>, vector<16x256xbf16>,
    %165 = arith.truncf %162 : vector<16x256xf32> to vector<16x256xbf16>
    %c272_93 = arith.constant 272 : index
    %c256_94 = arith.constant 256 : index
    %166 = vector.load %arg11[%c272_93, %c256_94] : memref<288x512xbf16, #tpu.memory_space<vmem>>, vector<16x256xbf16>
    tpu.vector_store %arg11[%c272_93, %c256_94], %165 {strides = array<i32>} : memref<288x512xbf16, #tpu.memory_space<vmem>>, vector<16x256xbf16>,
    %c0_95 = arith.constant 0 : index
    %c0_96 = arith.constant 0 : index
    %167 = vector.load %arg4[%c0_95, %c0_96] : memref<16x288xbf16, #tpu.memory_space<vmem>>, vector<16x288xbf16>
    %c0_97 = arith.constant 0 : index
    %c0_98 = arith.constant 0 : index
    %168 = vector.load %arg11[%c0_97, %c0_98] : memref<288x512xbf16, #tpu.memory_space<vmem>>, vector<288x512xbf16>
    %cst_99 = arith.constant dense<0.000000e+00> : vector<16x512xf32>
    %169 = tpu.matmul %167, %168, %cst_99 {dimension_numbers = #tpu.dot_dimension_numbers<[1], [0], [0], [1], [0, 0, 1, 1], [], []>} : vector<16x288xbf16>, vector<288x512xbf16>, vector<16x512xf32> -> vector<16x512xf32>
    %c0_100 = arith.constant 0 : index
    %c0_101 = arith.constant 0 : index
    %170 = vector.load %arg5[%c0_100, %c0_101] : memref<16x1xf32, #tpu.memory_space<vmem>>, vector<16x1xf32>
    %171 = vector.broadcast %170 : vector<16x1xf32> to vector<16x512xf32>
    %172 = arith.addf %169, %171 : vector<16x512xf32>
    %c0_102 = arith.constant 0 : index
    %c0_103 = arith.constant 0 : index
    %173 = vector.load %arg9[%c0_102, %c0_103] : memref<32x512xf32, #tpu.memory_space<vmem>>, vector<32x512xf32>
    %174 = arith.mulf %172, %172 : vector<16x512xf32>
    %175 = tpu.concatenate %172, %174 in 0 : vector<16x512xf32>, vector<16x512xf32> -> vector<32x512xf32>
    %cst_104 = arith.constant dense<0.000000e+00> : vector<32x32xf32>
    %176 = tpu.matmul %175, %173, %cst_104 {dimension_numbers = #tpu.dot_dimension_numbers<[1], [1], [0], [0], [0, 0, 1, 0], [], []>} : vector<32x512xf32>, vector<32x512xf32>, vector<32x32xf32> -> vector<32x32xf32>
    %177 = vector.extract_strided_slice %176 {offsets = [0, 0], sizes = [16, 32], strides = [1, 1]} : vector<32x32xf32> to vector<16x32xf32>
    %cst_105 = arith.constant 6.250000e-02 : f32
    %178 = vector.broadcast %cst_105 : f32 to vector<16x32xf32>
    %179 = arith.mulf %177, %178 : vector<16x32xf32>
    %180 = vector.extract_strided_slice %176 {offsets = [16, 0], sizes = [16, 32], strides = [1, 1]} : vector<32x32xf32> to vector<16x32xf32>
    %cst_106 = arith.constant 6.250000e-02 : f32
    %181 = vector.broadcast %cst_106 : f32 to vector<16x32xf32>
    %182 = arith.mulf %180, %181 : vector<16x32xf32>
    %183 = arith.mulf %179, %179 : vector<16x32xf32>
    %184 = arith.subf %182, %183 : vector<16x32xf32>
    %cst_107 = arith.constant 9.99999974E-6 : f32
    %185 = vector.broadcast %cst_107 : f32 to vector<16x32xf32>
    %186 = arith.addf %184, %185 : vector<16x32xf32>
    %187 = math.rsqrt %186 : vector<16x32xf32>
    %cst_108 = arith.constant 0.000000e+00 : f32
    %188 = vector.broadcast %cst_108 : f32 to vector<16x32xf32>
    %189 = arith.subf %188, %179 : vector<16x32xf32>
    %190 = arith.mulf %189, %187 : vector<16x32xf32>
    %191 = tpu.concatenate %190, %187 in 0 : vector<16x32xf32>, vector<16x32xf32> -> vector<32x32xf32>
    %cst_109 = arith.constant dense<0.000000e+00> : vector<32x512xf32>
    %192 = tpu.matmul %191, %173, %cst_109 {dimension_numbers = #tpu.dot_dimension_numbers<[1], [0], [0], [1], [0, 0, 1, 1], [], []>} : vector<32x32xf32>, vector<32x512xf32>, vector<32x512xf32> -> vector<32x512xf32>
    %193 = vector.extract_strided_slice %192 {offsets = [16, 0], sizes = [16, 512], strides = [1, 1]} : vector<32x512xf32> to vector<16x512xf32>
    %194 = arith.mulf %172, %193 : vector<16x512xf32>
    %195 = vector.extract_strided_slice %192 {offsets = [0, 0], sizes = [16, 512], strides = [1, 1]} : vector<32x512xf32> to vector<16x512xf32>
    %196 = arith.addf %194, %195 : vector<16x512xf32>
    %c0_110 = arith.constant 0 : index
    %c0_111 = arith.constant 0 : index
    %197 = vector.load %arg6[%c0_110, %c0_111] : memref<1x512xf32, #tpu.memory_space<vmem>>, vector<1x512xf32>
    %198 = vector.broadcast %197 : vector<1x512xf32> to vector<16x512xf32>
    %199 = arith.mulf %196, %198 : vector<16x512xf32>
    %c0_112 = arith.constant 0 : index
    %c0_113 = arith.constant 0 : index
    %200 = vector.load %arg7[%c0_112, %c0_113] : memref<1x512xf32, #tpu.memory_space<vmem>>, vector<1x512xf32>
    %201 = vector.broadcast %200 : vector<1x512xf32> to vector<16x512xf32>
    %202 = arith.addf %199, %201 : vector<16x512xf32>
    %203 = vector.extract_strided_slice %202 {offsets = [0, 0], sizes = [16, 256], strides = [1, 1]} : vector<16x512xf32> to vector<16x256xf32>
    %c0_114 = arith.constant 0 : index
    %c0_115 = arith.constant 0 : index
    %204 = vector.load %arg10[%c0_114, %c0_115] : memref<32x256xf32, #tpu.memory_space<vmem>>, vector<16x256xf32>
    tpu.vector_store %arg10[%c0_114, %c0_115], %203 {strides = array<i32>} : memref<32x256xf32, #tpu.memory_space<vmem>>, vector<16x256xf32>,
    %205 = vector.extract_strided_slice %202 {offsets = [0, 256], sizes = [16, 256], strides = [1, 1]} : vector<16x512xf32> to vector<16x256xf32>
    %c16_116 = arith.constant 16 : index
    %c0_117 = arith.constant 0 : index
    %206 = vector.load %arg10[%c16_116, %c0_117] : memref<32x256xf32, #tpu.memory_space<vmem>>, vector<16x256xf32>
    tpu.vector_store %arg10[%c16_116, %c0_117], %205 {strides = array<i32>} : memref<32x256xf32, #tpu.memory_space<vmem>>, vector<16x256xf32>,
    return
  }
  func.func @transform_0(%arg0: i32) -> (i32, i32) {
    %c0_i32 = arith.constant 0 : i32
    %c0_i32_0 = arith.constant 0 : i32
    return %arg0, %c0_i32 : i32, i32
  }
  func.func @transform_1(%arg0: i32) -> (i32, i32) {
    %c0_i32 = arith.constant 0 : i32
    %c0_i32_0 = arith.constant 0 : i32
    return %arg0, %c0_i32 : i32, i32
  }
  func.func @transform_2(%arg0: i32) -> (i32, i32) {
    %c0_i32 = arith.constant 0 : i32
    %c0_i32_0 = arith.constant 0 : i32
    %c0_i32_1 = arith.constant 0 : i32
    return %c0_i32, %c0_i32_0 : i32, i32
  }
  func.func @transform_3(%arg0: i32) -> (i32, i32) {
    %c0_i32 = arith.constant 0 : i32
    %c0_i32_0 = arith.constant 0 : i32
    %c0_i32_1 = arith.constant 0 : i32
    return %c0_i32, %c0_i32_0 : i32, i32
  }
  func.func @transform_4(%arg0: i32) -> (i32, i32) {
    %c0_i32 = arith.constant 0 : i32
    %c0_i32_0 = arith.constant 0 : i32
    %c0_i32_1 = arith.constant 0 : i32
    return %c0_i32, %c0_i32_0 : i32, i32
  }
  func.func @transform_5(%arg0: i32) -> (i32, i32) {
    %c0_i32 = arith.constant 0 : i32
    %c0_i32_0 = arith.constant 0 : i32
    %c0_i32_1 = arith.constant 0 : i32
    return %c0_i32, %c0_i32_0 : i32, i32
  }
  func.func @transform_6(%arg0: i32) -> (i32, i32) {
    %c0_i32 = arith.constant 0 : i32
    %c0_i32_0 = arith.constant 0 : i32
    %c0_i32_1 = arith.constant 0 : i32
    return %c0_i32, %c0_i32_0 : i32, i32
  }
  func.func @transform_7(%arg0: i32) -> (i32, i32) {
    %c0_i32 = arith.constant 0 : i32
    %c0_i32_0 = arith.constant 0 : i32
    %c0_i32_1 = arith.constant 0 : i32
    return %c0_i32, %c0_i32_0 : i32, i32
  }
  func.func @transform_8(%arg0: i32) -> (i32, i32) {
    %c0_i32 = arith.constant 0 : i32
    %c0_i32_0 = arith.constant 0 : i32
    %c0_i32_1 = arith.constant 0 : i32
    return %c0_i32, %c0_i32_0 : i32, i32
  }
  func.func @transform_9(%arg0: i32) -> (i32, i32) {
    %c0_i32 = arith.constant 0 : i32
    %c0_i32_0 = arith.constant 0 : i32
    return %arg0, %c0_i32 : i32, i32
  }
}

</mosaic_0001>

<bundles_post_ra>
// kernel: tpu_custom_call.1
= control target key start
LH: loop header
LB: loop body
LE: loop exit
PB: predicated region body
PF: predicated region fallthrough
CT: control target
= control target key end

     0   :  { %s4462_s0 = inlined_call_operand.hbm [shape: f32[64,256], index: 0, kind: input, shape index: {}]   ;;  %s4463_s1 = inlined_call_operand.hbm [shape: f32[64,64], index: 1, kind: input, shape index: {}]   ;;  %s4464_s2 = inlined_call_operand.hbm [shape: f32[64,256], index: 2, kind: input, shape index: {}]   ;;  %s4465_s3 = inlined_call_operand.vmem [shape: bf16[16,288], index: 3, kind: input, shape index: {}]   ;;  %s4466_s4 = inlined_call_operand.vmem [shape: f32[16,1], index: 4, kind: input, shape index: {}]   ;;  %s4467_s5 = inlined_call_operand.hbm [shape: f32[1,512], index: 5, kind: input, shape index: {}]   ;;  %s4468_s6 = inlined_call_operand.hbm [shape: f32[1,512], index: 6, kind: input, shape index: {}]   ;;  %s4469_s7 = inlined_call_operand.vmem [shape: f32[8,256], index: 7, kind: input, shape index: {}]   ;;  %s4470_s8 = inlined_call_operand.hbm [shape: f32[32,512], index: 8, kind: input, shape index: {}]   ;;  %s4471_s9 = inlined_call_operand.hbm [shape: f32[64,256], index: 9, kind: output, shape index: {}]  }
   0x1   :  { %4522 = sst [smem:[#allocation58_spill]] %s4462_s0 }
   0x2   :  { %4523 = sst [smem:[#allocation59_spill]] %s4464_s2 }
   0x3   :  { %4524 = sst [smem:[#allocation60_spill]] %s4467_s5 }
   0x4   :  { %4525 = sst [smem:[#allocation61_spill]] %s4468_s6 }
   0x5   :  { %4526 = sst [smem:[#allocation62_spill]] %s4471_s9 }
   0x6   :  { %14 = vsyncpa [#allocation4], 0 }
   0x7   :  { %16 = vsyncpa [#allocation4 + $0x1], 0 }
   0x8   :  { %17 = vsyncpa [#allocation7], 0 }
   0x9   :  { %19 = vsyncpa [#allocation7 + $0x1], 0 }
   0xa   :  { %20 = vsyncpa [#allocation10], 0 }
   0xb   :  { %21 = vsyncpa [#allocation13], 0 }
   0xc   :  { %22 = vsyncpa [#allocation5], 0 }
   0xd   :  { %24 = vsyncpa [#allocation5 + $0x1], 0  ;;  %s2847_s30 = smov 0   ;;  %s2849_s10 = smov 0  }
   0xe   :  { %s2851_s11 = smov 0   ;;  %s2853_s12 = smov 0  }
   0xf LB: > { %4527 = sst [smem:[#allocation21_spill]] %s2759_s30  ;;  %s2868_s13 = sadd.s32 4294967295, %s2771_s12   ;;  %s2771_s12 = sphi %s2853_s12, %s4646_s12   ;;  %s2767_s11 = sphi %s2851_s11, %s4645_s11   ;;  %s2763_s10 = sphi %s2849_s10, %s4644_s10   ;;  %s2759_s30 = sphi %s2847_s30, %s4643_s30  }
  0x10   : > { %s2261_s14 = sadd.s32 4294967294, %s2771_s12   ;;  %p50_p0 = scmp.ne.s32.totalorder %s2763_s10, %s2759_s30 }
  0x11   : > { %p4472_p1 = scmp.eq.s32.totalorder %s2868_s13, 0  ;;  %p253_p3 = scmp.eq.s32.totalorder %s2261_s14, 1 }
  0x12   : > { %p2262_p5 = scmp.ge.s32.totalorder %s2771_s12, 1  ;;  %p260_p7 = scmp.lt.s32.totalorder %s2771_s12, 3 }
  0x13   : > { %p2877_p4 = por %p4472_p1, %p50_p0  ;;  %p2882_p6 = por %p253_p3, %p50_p0 }
  0x14   : > { %p2887_p8 = pnand %p2262_p5, %p260_p7  ;;  %s2773_s18 = smov [#allocation8]  }
  0x15   : > { %s4528_s15 = scalar_select %p2877_p4, 1, 0 }
  0x16   : > { %s4529_s16 = scalar_select %p2882_p6, 1, 0 }
  0x17   : > { %s4531_s17 = scalar_select %p2887_p8, 1, 0 }
  0x18   : > { %4530 = sst [smem:[#allocation22_spill]] %s4529_s16  ;;  %s272_s19 = sshll.u32 %s2773_s18, 4  ;;  %s2891_s19 = int_to_ptr.vmem [resolvable:$true] %s272_s19 }
  0x19   : > { %p2416_p9 = pneg %p2887_p8  ;;  %s2774_s21 = smov [#allocation9]  }
  0x1a   : > { %s292_s22 = sshll.u32 %s2774_s21, 4  ;;  %s2775_s23 = smov [#allocation11]   ;;  %s2902_s22 = int_to_ptr.vmem [resolvable:$true] %s292_s22 }
  0x1b   : > { %p2898_p11 = pnand %p2416_p9, %p4472_p1  ;;  %s2904_s24 = sshll.u32 %s2775_s23, 4  ;;  %s304_s24 = int_to_ptr.vmem [resolvable:$true] %s2904_s24 }
  0x1c   : > { %s4533_s2 = sld [smem:[#allocation59_spill]] }
  0x1d   : > { %p2914_p13 = pneg %p2898_p11 }
  0x22   : > { %s2517_s27 = scalar_lea.hbm %s4533_s2, 2048 }
  0x23   : > { %p2518_p12 = scmp.ne.s32.totalorder %s4533_s2, %s2517_s27  ;;  %p2524_p5 = scmp.lt.u32.totalorder %s2517_s27, %s4533_s2 }
  0x25   : > { %p2520_p0 = pnand %p2914_p13, %p2518_p12 }
  0x27   : > { %p2521_p3 = pneg %p2520_p0 }
  0x29   : > { %p2526_p7 = pnand %p2524_p5, %p2521_p3 }
  0x2b   : > { %2529 = shalt.err (!%p2526_p7)
}
  0x2c   : > { %s2530_s23 = scalar_lea.vmem %s2891_s19, 2048  ;;  %p2538_p2 = scmp.lt.s32.totalorder %s2891_s19, %s2891_s19 }
  0x2d   : > { %p2531_p9 = scmp.ne.s32.totalorder %s2891_s19, %s2530_s23  ;;  %p2539_p6 = scmp.lt.s32.totalorder %s2530_s23, %s2530_s23 }
  0x2f   : > { %p2533_p10 = pnand %p2531_p9, %p2914_p13  ;;  %p2540_p12 = por %p2539_p6, %p2538_p2 }
  0x31   : > { %p2534_p1 = pneg %p2533_p10 }
  0x33   : > { %p2541_p0 = pnand %p2540_p12, %p2534_p1 }
  0x35   : > { %2544 = shalt.err (!%p2541_p0)
}
  0x36   : > { %s4478_s25 = smov 256   ;;  %s4479_s26 = smov 16  }
  0x37   : > { %2419 = dma.hbm_to_vmem [thread:$0]  (!%p2898_p11), %s4533_s2, 2048, %s2891_s19, [#allocation7], %s4478_s25, %s4478_s25, %s4479_s26  }
  0x38   : > { %s4535_s5 = sld [smem:[#allocation60_spill]] }
  0x3e   : > { %s2545_s21 = scalar_lea.hbm %s4535_s5, 64 }
  0x3f   : > { %p2546_p1 = scmp.ne.s32.totalorder %s4535_s5, %s2545_s21  ;;  %p2552_p10 = scmp.lt.u32.totalorder %s2545_s21, %s4535_s5 }
  0x41   : > { %p2548_p2 = pnand %p2546_p1, %p2914_p13 }
  0x43   : > { %p2549_p6 = pneg %p2548_p2 }
  0x45   : > { %p2554_p3 = pnand %p2552_p10, %p2549_p6 }
  0x47   : > { %2557 = shalt.err (!%p2554_p3)
}
  0x48   : > { %s2558_s19 = scalar_lea.vmem %s2902_s22, 64  ;;  %p2566_p12 = scmp.lt.s32.totalorder %s2902_s22, %s2902_s22 }
  0x49   : > { %p2559_p5 = scmp.ne.s32.totalorder %s2902_s22, %s2558_s19  ;;  %p2567_p0 = scmp.lt.s32.totalorder %s2558_s19, %s2558_s19 }
  0x4b   : > { %p2561_p7 = pnand %p2559_p5, %p2914_p13  ;;  %p2568_p1 = por %p2567_p0, %p2566_p12 }
  0x4d   : > { %p2562_p9 = pneg %p2561_p7 }
  0x4f   : > { %p2569_p2 = pnand %p2568_p1, %p2562_p9 }
  0x51   : > { %2572 = shalt.err (!%p2569_p2)
}
  0x52   : > { %2422 = dma.hbm_to_vmem [thread:$0]  (!%p2898_p11), %s4535_s5, 64, %s2902_s22, [#allocation10]  }
  0x53   : > { %s4536_s6 = sld [smem:[#allocation61_spill]] }
  0x59   : > { %s2573_s28 = scalar_lea.hbm %s4536_s6, 64 }
  0x5a   : > { %p2574_p6 = scmp.ne.s32.totalorder %s4536_s6, %s2573_s28  ;;  %p2580_p5 = scmp.lt.u32.totalorder %s2573_s28, %s4536_s6 }
  0x5c   : > { %p2576_p10 = pnand %p2574_p6, %p2914_p13 }
  0x5e   : > { %p2577_p3 = pneg %p2576_p10 }
  0x60   : > { %p2582_p7 = pnand %p2580_p5, %p2577_p3 }
  0x62   : > { %2585 = shalt.err (!%p2582_p7)
}
  0x63   : > { %s2586_s19 = scalar_lea.vmem %s304_s24, 64  ;;  %p2594_p1 = scmp.lt.s32.totalorder %s304_s24, %s304_s24 }
  0x64   : > { %p2587_p9 = scmp.ne.s32.totalorder %s304_s24, %s2586_s19  ;;  %p2595_p2 = scmp.lt.s32.totalorder %s2586_s19, %s2586_s19 }
  0x66   : > { %p2589_p12 = pnand %p2587_p9, %p2914_p13  ;;  %p2596_p4 = por %p2595_p2, %p2594_p1 }
  0x68   : > { %p2590_p0 = pneg %p2589_p12 }
  0x6a   : > { %p2597_p8 = pnand %p2596_p4, %p2590_p0 }
  0x6c   : > { %2600 = shalt.err (!%p2597_p8)
}
  0x6d   : > { %2425 = dma.hbm_to_vmem [thread:$0]  (!%p2898_p11), %s4536_s6, 64, %s304_s24, [#allocation10]  }
  0x6e   : > { %s2778_s30 = smov [#allocation12]   ;;  %s2601_s29 = scalar_lea.hbm %s4470_s8, 2048 }
  0x6f   : > { %s316_s16 = sshll.u32 %s2778_s30, 4  ;;  %p2602_p6 = scmp.ne.s32.totalorder %s4470_s8, %s2601_s29  ;;  %s317_s16 = int_to_ptr.vmem [resolvable:$true] %s316_s16 }
  0x70   : > { %p2608_p10 = scmp.lt.u32.totalorder %s2601_s29, %s4470_s8 }
  0x71   : > { %p2604_p4 = pnand %p2602_p6, %p2914_p13 }
  0x73   : > { %p2605_p8 = pneg %p2604_p4 }
  0x75   : > { %p2610_p3 = pnand %p2608_p10, %p2605_p8 }
  0x77   : > { %2613 = shalt.err (!%p2610_p3)
}
  0x78   : > { %s2614_s24 = scalar_lea.vmem %s317_s16, 2048  ;;  %p2622_p12 = scmp.lt.s32.totalorder %s317_s16, %s317_s16 }
  0x79   : > { %p2615_p5 = scmp.ne.s32.totalorder %s317_s16, %s2614_s24  ;;  %p2623_p0 = scmp.lt.s32.totalorder %s2614_s24, %s2614_s24 }
  0x7b   : > { %p2617_p7 = pnand %p2615_p5, %p2914_p13  ;;  %p2624_p1 = por %p2623_p0, %p2622_p12 }
  0x7d   : > { %p2618_p9 = pneg %p2617_p7 }
  0x7f   : > { %p2625_p2 = pnand %p2624_p1, %p2618_p9 }
  0x81   : > { %2628 = shalt.err (!%p2625_p2)
}
  0x82   : > { %s2779_s22 = smov 512   ;;  %s2780_s14 = smov 32  }
  0x83   : > { %2428 = dma.hbm_to_vmem [thread:$0]  (!%p2898_p11), %s4470_s8, 2048, %s317_s16, [#allocation13], %s2779_s22, %s2779_s22, %s2780_s14  }
  0x84   : > { %s2999_s27 = sadd.s32 1, %s2771_s12   ;;  %s37_s29 = sadd.s32 1, %s2767_s11 }
  0x85   : > { %s34_s28 = ssub.s32 %s2771_s12, %s2999_s27  ;;  %p44_p6 = scmp.ne.s32.totalorder %s2767_s11, %s2763_s10 }
  0x86   : > { %p35_p13 = scmp.eq.s32.totalorder %s34_s28, 0  ;;  %p45_p4 = scmp.eq.s32.totalorder %s2771_s12, 0 }
  0x87   : > { %p4537_p10 = scmp.eq.s32.totalorder %s2868_s13, 1  ;;  %p2444_p5 = scmp.lt.s32.totalorder %s2771_s12, 2 }
  0x88   : > { %s3008_s18 = scalar_select %p35_p13, %s2767_s11, %s37_s29  }
  0x89   : > { %p46_p8 = por %p45_p4, %p44_p6  ;;  %p3012_p3 = por %p4537_p10, %p44_p6 }
  0x8a   : > { %s3018_s20 = sand.u32 1, %s2767_s11   ;;  %s2314_s23 = sshll.u32 %s2771_s12, 10 }
  0x8b   : > { %s2268_s16 = sshll.u32 %s3018_s20, 6  ;;  %s4539_s0 = sld [smem:[#allocation58_spill]] }
  0x8c   : > { %s334_s14 = scalar_lea.vmem [#allocation3], %s2268_s16  ;;  %p3029_p11 = pnand %p2444_p5, %p46_p8 }
  0x8d   : > { %s342_s9 = sshll.u32 %s334_s14, 4  ;;  %s2272_s29 = sshll.u32 %s3018_s20, 5  ;;  %s3027_s9 = int_to_ptr.vmem [resolvable:$true] %s342_s9 }
  0x8e   : > { %s331_s25 = scalar_lea.sflag [#allocation4], %s3018_s20  ;;  %p2631_p9 = pneg %p3029_p11 }
  0x91   : > { %s3025_s22 = scalar_lea.hbm %s4539_s0, %s2314_s23  ;;  %s2634_s24 = scalar_lea.hbm %s4539_s0, 2048 }
  0x92   : > { %s2629_s19 = scalar_lea.hbm %s3025_s22, 1024  ;;  %p2635_p1 = scmp.lt.u32.totalorder %s3025_s22, %s4539_s0 }
  0x93   : > { %p2630_p7 = scmp.ne.s32.totalorder %s3025_s22, %s2629_s19  ;;  %p2636_p2 = scmp.lt.u32.totalorder %s2634_s24, %s2629_s19 }
  0x94   : > { %p2638_p6 = scmp.lt.u32.totalorder %s2629_s19, %s3025_s22 }
  0x95   : > { %p2632_p12 = pnand %p2631_p9, %p2630_p7  ;;  %p2637_p13 = por %p2636_p2, %p2635_p1 }
  0x97   : > { %p2633_p0 = pneg %p2632_p12  ;;  %p2639_p4 = por %p2638_p6, %p2637_p13 }
  0x99   : > { %p2640_p8 = pnand %p2639_p4, %p2633_p0 }
  0x9b   : > { %2643 = shalt.err (!%p2640_p8)
}
  0x9c   : > { %s2644_s28 = scalar_lea.vmem %s3027_s9, 1024  ;;  %s2781_s16 = smov [#allocation3]  }
  0x9d   : > { %p2645_p10 = scmp.ne.s32.totalorder %s3027_s9, %s2644_s28  ;;  %s2649_s23 = sshll.u32 %s2781_s16, 4  ;;  %s2650_s23 = int_to_ptr.vmem [resolvable:$false] %s2649_s23 }
  0x9e   : > { %s2651_s26 = scalar_lea.vmem %s2650_s23, 2048  ;;  %p2652_p12 = scmp.lt.s32.totalorder %s3027_s9, %s2650_s23 }
  0x9f   : > { %p2647_p5 = pnand %p2645_p10, %p2631_p9  ;;  %p2653_p1 = scmp.lt.s32.totalorder %s2651_s26, %s2644_s28 }
  0xa1   : > { %p2648_p7 = pneg %p2647_p5  ;;  %p2654_p2 = por %p2653_p1, %p2652_p12 }
  0xa3   : > { %p2655_p13 = pnand %p2654_p2, %p2648_p7 }
  0xa5   : > { %2658 = shalt.err (!%p2655_p13)
}
  0xa6   : > { %s4541_s19 = smov 16   ;;  %s4542_s24 = smov 256  }
  0xa7   : > { %2432 = dma.hbm_to_vmem [thread:$0]  (!%p3029_p11), %s3025_s22, 1024, %s3027_s9, %s331_s25, %s4542_s24, %s4542_s24, %s4541_s19  }
  0xa8   : > { %s2315_s14 = sshll.u32 %s2771_s12, 9  ;;  %s356_s26 = scalar_lea.vmem [#allocation6], %s2272_s29 }
  0xa9   : > { %s3070_s23 = scalar_lea.hbm %s4463_s1, %s2315_s14  ;;  %s363_s0 = sshll.u32 %s356_s26, 4  ;;  %s3074_s0 = int_to_ptr.vmem [resolvable:$true] %s363_s0 }
  0xaa   : > { %s4543_s2 = sand.u32 1, %s2771_s12   ;;  %s2659_s6 = scalar_lea.hbm %s3070_s23, 512 }
  0xab   : > { %s3078_s5 = scalar_lea.sflag [#allocation7], %s4543_s2  ;;  %p2660_p0 = scmp.ne.s32.totalorder %s3070_s23, %s2659_s6 }
  0xac   : > { %s2664_s20 = scalar_lea.hbm %s4463_s1, 1024  ;;  %p2665_p8 = scmp.lt.u32.totalorder %s3070_s23, %s4463_s1 }
  0xad   : > { %p2662_p6 = pnand %p2660_p0, %p2631_p9  ;;  %p2666_p10 = scmp.lt.u32.totalorder %s2664_s20, %s2659_s6 }
  0xae   : > { %p2668_p7 = scmp.lt.u32.totalorder %s2659_s6, %s3070_s23 }
  0xaf   : > { %p2663_p4 = pneg %p2662_p6  ;;  %p2667_p5 = por %p2666_p10, %p2665_p8 }
  0xb1   : > { %p2669_p12 = por %p2668_p7, %p2667_p5 }
  0xb3   : > { %p2670_p1 = pnand %p2669_p12, %p2663_p4 }
  0xb5   : > { %2673 = shalt.err (!%p2670_p1)
}
  0xb6   : > { %s2674_s2 = scalar_lea.vmem %s3074_s0, 512  ;;  %s2782_s29 = smov [#allocation6]  }
  0xb7   : > { %p2675_p2 = scmp.ne.s32.totalorder %s3074_s0, %s2674_s2  ;;  %s2679_s24 = sshll.u32 %s2782_s29, 4  ;;  %s2680_s24 = int_to_ptr.vmem [resolvable:$false] %s2679_s24 }
  0xb8   : > { %s2681_s14 = scalar_lea.vmem %s2680_s24, 1024  ;;  %p2682_p6 = scmp.lt.s32.totalorder %s3074_s0, %s2680_s24 }
  0xb9   : > { %p2677_p13 = pnand %p2675_p2, %p2631_p9  ;;  %p2683_p8 = scmp.lt.s32.totalorder %s2681_s14, %s2674_s2 }
  0xbb   : > { %p2678_p0 = pneg %p2677_p13  ;;  %p2684_p10 = por %p2683_p8, %p2682_p6 }
  0xbd   : > { %p2685_p5 = pnand %p2684_p10, %p2678_p0 }
  0xbf   : > { %2688 = shalt.err (!%p2685_p5)
}
  0xc0   : > { %s2783_s6 = smov 128   ;;  %s2784_s16 = smov 8  }
  0xc1   : > { %2435 = dma.hbm_to_vmem [thread:$0]  (!%p3029_p11), %s3070_s23, 512, %s3074_s0, %s3078_s5, %s2783_s6, %s2783_s6, %s2784_s16  }
  0xc2   : > { %p4544_p9 = scmp.ne.s32.totalorder %s4531_s17, 0 }
  0xc4   : > { %375 = sbr.rel (%p4544_p9) target bundleno = 1442 (0x5a2), region = 56 }
  0xcb   : > { %s3107_s28 = sand.u32 1, %s2763_s10   ;;  %p4545_p4 = scmp.ne.s32.totalorder %s4528_s15, 0 }
  0xcc   : > { %s2276_s26 = sshll.u32 %s3107_s28, 6  ;;  %s378_s25 = scalar_lea.sflag [#allocation4], %s3107_s28 }
  0xcd   : > { %s3113_s22 = scalar_lea.vmem [#allocation3], %s2276_s26 }
  0xce   : > { %2734 = dma.done.wait (%p4545_p4), %s378_s25, 1024  }
  0xcf   : > { %2736 = vsyncadd (%p4545_p4), %s378_s25, 4294966272  ;;  %s386_s0 = sand.u32 1, %s2868_s13   ;;  %s2277_s5 = sshll.u32 %s3107_s28, 5 }
  0xd0   : > { %s387_s17 = scalar_lea.sflag [#allocation7], %s386_s0  ;;  %s3121_s30 = scalar_lea.vmem [#allocation6], %s2277_s5 }
  0xd1   : > { %2738 = dma.done.wait (%p4545_p4), %s387_s17, 512  }
  0xd2   : > { %2740 = vsyncadd (%p4545_p4), %s387_s17, 4294966784  ;;  %p4546_p11 = scmp.eq.s32.totalorder %s2868_s13, 0 }
  0xd4   : > { %2742 = dma.done.wait (%p4546_p11), [#allocation7], 2048   ;;  %p4547_p7 = pmov %p4546_p11 }
  0xd6   : > { %2744 = vsyncadd (%p4547_p7), [#allocation7], 4294965248  ;;  %p4548_p12 = pmov %p4547_p7 }
  0xd7   : > { %p4549_p1 = pmov %p4547_p7 }
  0xd8   : > { %2746 = dma.done.wait (%p4548_p12), [#allocation10], 128  }
  0xd9   : > { %2748 = vsyncadd (%p4549_p1), [#allocation10], 4294967168  ;;  %p4550_p2 = pmov %p4549_p1 }
  0xda   : > { %p4551_p13 = pmov %p4549_p1 }
  0xdb   : > { %2750 = dma.done.wait (%p4550_p2), [#allocation13], 2048  }
  0xdc   : > { %2752 = vsyncadd (%p4551_p13), [#allocation13], 4294965248  ;;  %v4480_v0 = vmov 0.0   ;;  %v455_v1 = vld [vmem:[#allocation8 + $0x8] sm:$0xff]  ;;  %v457_v2 = vld [vmem:[#allocation8 + $0x18] sm:$0xff]  ;;  %s2786_s15 = smov 17   ;;  %v582_v37 = vlaneseq }
  0xdd   : > { %547 = vmatprep.mubr.f32.mxu0 %v4480_v0  ;;  %v454_v3 = vld [vmem:[#allocation8] sm:$0xff]  ;;  %v2318_v4 = vpack.c.bf16 %v457_v2, %v455_v1  ;;  %v456_v5 = vld [vmem:[#allocation8 + $0x10] sm:$0xff]  ;;  %v459_v6 = vld [vmem:[#allocation8 + $0x28] sm:$0xff]  ;;  %s2787_s23 = smov 16   ;;  %vm470_vm0 = vcmask 523264   ;;  %s2788_s20 = smov 15  }
  0xde   : > { %v461_v7 = vld [vmem:[#allocation8 + $0x38] sm:$0xff]  ;;  %v2320_v8 = vpack.c.bf16 %v456_v5, %v454_v3  ;;  %v458_v10 = vld [vmem:[#allocation8 + $0x20] sm:$0xff]  ;;  %v460_v11 = vld [vmem:[#allocation8 + $0x30] sm:$0xff]  ;;  %s2789_s9 = smov 1   ;;  %s2790_s19 = smov 127   ;;  %v3279_v38 = vshrl.u32 %v582_v37, 7 }
  0xdf   : > { %v2322_v9 = vpack.c.bf16 %v461_v7, %v459_v6  ;;  %v463_v12 = vld [vmem:[#allocation8 + $0x48] sm:$0xff]  ;;  %2319 = vmatprep.subr.bf16.mxu0 %v2318_v4  ;;  %v465_v13 = vld [vmem:[#allocation8 + $0x58] sm:$0xff]  ;;  %v2324_v14 = vpack.c.bf16 %v460_v11, %v458_v10  ;;  %v462_v16 = vld [vmem:[#allocation8 + $0x40] sm:$0xff]  ;;  %s2791_s2 = smov 113   ;;  %s2792_s29 = smov 112   ;;  %v3281_v39 = vand.u32 127, %v582_v37 }
  0xe0   : > { %2321 = vmatpush1.bf16.msra.mxu0 %v2320_v8  ;;  %v2326_v15 = vpack.c.bf16 %v465_v13, %v463_v12  ;;  %v464_v17 = vld [vmem:[#allocation8 + $0x50] sm:$0xff]  ;;  %v467_v18 = vld [vmem:[#allocation8 + $0x68] sm:$0xff]  ;;  %v469_v19 = vld [vmem:[#allocation8 + $0x78] sm:$0xff]  ;;  %4552 = vst [vmem:[#allocation23_spill] sm:$0xff] %v3279_v38  ;;  %v3284_v40 = vsub.s32 1, %v3279_v38  ;;  %v3287_v41 = vsub.s32 0, %v3279_v38 }
  0xe1   : > { %2323 = vmatprep.subr.bf16.mxu0 %v2322_v9  ;;  %v3141_v20 = vld [vmem:[%s3113_s22 + $0x8] sm:$0xff]  ;;  %v3146_v21 = vld [vmem:[%s3113_s22] sm:$0xff]  ;;  %v2328_v22 = vpack.c.bf16 %v464_v17, %v462_v16  ;;  %v468_v24 = vld [vmem:[#allocation8 + $0x70] sm:$0xff]  ;;  %v2330_v26 = vpack.c.bf16 %v469_v19, %v467_v18  ;;  %vm602_vm1 = vcmp.lt.s32.totalorder %v3281_v39, 17  ;;  %vm994_vm2 = vcmp.lt.s32.totalorder %v3281_v39, 127  ;;  %s2795_s16 = smov [#allocation14]  }
  0xe2   : > { %596 = vrot.lane.b32.xlu1 %v3141_v20, %s2786_s15  ;;  %v466_v23 = vld [vmem:[#allocation8 + $0x60] sm:$0xff]  ;;  %592 = vrot.lane.b32.xlu0 %v3146_v21, %s2786_s15  ;;  %v3151_v25 = vld [vmem:[%s3113_s22 + $0x18] sm:$0xff]  ;;  %v3154_v27 = vld [vmem:[%s3113_s22 + $0x10] sm:$0xff]  ;;  %vm1088_vm3 = vcmp.lt.s32.totalorder %v3281_v39, 113  ;;  %vm1182_vm4 = vcmp.lt.s32.totalorder %v3281_v39, 112  ;;  %vm696_vm5 = vcmp.lt.s32.totalorder %v3281_v39, 16 }
  0xe3   : > { %v2332_v28 = vpack.c.bf16 %v468_v24, %v466_v23  ;;  %v450_v29 = vld [vmem:[%s3121_s30] sm:$0xff]  ;;  %v451_v30 = vld [vmem:[%s3121_s30 + $0x8] sm:$0xff]  ;;  %v3173_v31 = vld [vmem:[%s3113_s22 + $0x30] sm:$0xff]  ;;  %vm790_vm6 = vcmp.lt.s32.totalorder %v3281_v39, 15  ;;  %vm884_vm7 = vcmp.lt.s32.totalorder %v3281_v39, 1  ;;  %vm1276_vm8 = vcmp.lt.s32.totalorder %v3281_v39, 111 }
  0xe4   : > { %2325 = vmatpush1.bf16.msra.mxu0 %v2324_v14  ;;  %v3176_v32 = vld [vmem:[%s3113_s22 + $0x20] sm:$0xff]  ;;  %v452_v33 = vld [vmem:[%s3121_s30 + $0x10] sm:$0xff]  ;;  %v3186_v34 = vld [vmem:[%s3113_s22 + $0x38] sm:$0xff]  ;;  %vm1452_vm9 = vcmask 261120   ;;  %v4636_v39 = vmov 0.0   ;;  %s2693_s25 = sshll.u32 %s2795_s16, 4  ;;  %s2694_s25 = int_to_ptr.vmem [resolvable:$false] %s2693_s25 }
  0xe5   : > { %2327 = vmatprep.subr.bf16.mxu0 %v2326_v15  ;;  %v3189_v35 = vld [vmem:[%s3113_s22 + $0x28] sm:$0xff]  ;;  %v453_v36 = vld [vmem:[%s3121_s30 + $0x18] sm:$0xff]  ;;  %s2793_s30 = smov 111   ;;  %s2695_s0 = scalar_lea.vmem %s2694_s25, 2048 }
  0xe6   : > { %598 = vrot.lane.b32.xlu1 %v3151_v25, %s2786_s15  ;;  %594 = vrot.lane.b32.xlu0 %v3154_v27, %s2786_s15  ;;  %v580_v42 = vld [vmem:[%s4469_s7] ss:$8 sm:$0x3] }
  0xe7   : > { %v3294_v45 = vrot.slane %v580_v42, %v3284_v40  ;;  %v3297_v46 = vrot.slane %v580_v42, %v3287_v41 }
  0xe8   : > { %2329 = vmatpush1.bf16.msra.mxu0 %v2328_v22 }
  0xe9   : > { %2331 = vmatprep.subr.bf16.mxu0 %v2330_v26 }
  0xea   : > { %690 = vrot.lane.b32.xlu1 %v3154_v27, %s2787_s23  ;;  %688 = vrot.lane.b32.xlu0 %v3146_v21, %s2787_s23 }
  0xec   : > { %2333 = vmatpush1.bf16.msra.mxu0 %v2332_v28 }
  0xee   : > { %694 = vrot.lane.b32.xlu1 %v3151_v25, %s2787_s23  ;;  %692 = vrot.lane.b32.xlu0 %v3141_v20, %s2787_s23 }
  0xef   : > { %2283 = vmatmul.mubr.msk.f32.vlgmr.msra.gmra.mrb[0].mxu0 %vm470_vm0, %v450_v29 }
  0xf0   : > { %553 = vmatprep.mubr.f32.mxu0 %v4480_v0 }
  0xf2   : > { %637 = vrot.lane.b32.xlu1 %v3173_v31, %s2786_s15  ;;  %635 = vrot.lane.b32.xlu0 %v3176_v32, %s2786_s15 }
  0xf3   : > { %2284 = vmatmul.mubr.msk.f32.gmra.mrb[2].mxu0 %vm470_vm0, %v451_v30 }
  0xf4   : > { %559 = vmatprep.mubr.f32.mxu0 %v4480_v0 }
  0xf6   : > { %641 = vrot.lane.b32.xlu1 %v3186_v34, %s2786_s15  ;;  %639 = vrot.lane.b32.xlu0 %v3189_v35, %s2786_s15 }
  0xf7   : > { %2285 = vmatmul.mubr.msk.f32.gmra.mrb[4].mxu0 %vm470_vm0, %v452_v33 }
  0xf8   : > { %565 = vmatprep.mubr.f32.mxu0 %v4480_v0 }
  0xfa   : > { %784 = vrot.lane.b32.xlu1 %v3154_v27, %s2788_s20  ;;  %782 = vrot.lane.b32.xlu0 %v3146_v21, %s2788_s20 }
  0xfb   : > { %2286 = vmatmul.mubr.msk.f32.gmra.mrb[6].mxu0 %vm470_vm0, %v453_v36 }
  0xfe   : > { %788 = vrot.lane.b32.xlu1 %v3151_v25, %s2788_s20  ;;  %786 = vrot.lane.b32.xlu0 %v3141_v20, %s2788_s20 }
 0x102   : > { %731 = vrot.lane.b32.xlu1 %v3173_v31, %s2787_s23  ;;  %729 = vrot.lane.b32.xlu0 %v3176_v32, %s2787_s23 }
 0x106   : > { %735 = vrot.lane.b32.xlu1 %v3186_v34, %s2787_s23  ;;  %733 = vrot.lane.b32.xlu0 %v3189_v35, %s2787_s23 }
 0x10a   : > { %878 = vrot.lane.b32.xlu1 %v3154_v27, %s2789_s9  ;;  %876 = vrot.lane.b32.xlu0 %v3146_v21, %s2789_s9 }
 0x10e   : > { %882 = vrot.lane.b32.xlu1 %v3151_v25, %s2789_s9  ;;  %880 = vrot.lane.b32.xlu0 %v3141_v20, %s2789_s9 }
 0x112   : > { %825 = vrot.lane.b32.xlu1 %v3173_v31, %s2788_s20  ;;  %823 = vrot.lane.b32.xlu0 %v3176_v32, %s2788_s20 }
 0x116   : > { %829 = vrot.lane.b32.xlu1 %v3186_v34, %s2788_s20  ;;  %827 = vrot.lane.b32.xlu0 %v3189_v35, %s2788_s20 }
 0x11a   : > { %919 = vrot.lane.b32.xlu1 %v3173_v31, %s2789_s9  ;;  %917 = vrot.lane.b32.xlu0 %v3176_v32, %s2789_s9 }
 0x11e   : > { %923 = vrot.lane.b32.xlu1 %v3186_v34, %s2789_s9  ;;  %921 = vrot.lane.b32.xlu0 %v3189_v35, %s2789_s9 }
 0x122   : > { %988 = vrot.lane.b32.xlu1 %v3154_v27, %s2790_s19  ;;  %986 = vrot.lane.b32.xlu0 %v3146_v21, %s2790_s19 }
 0x126   : > { %992 = vrot.lane.b32.xlu1 %v3151_v25, %s2790_s19  ;;  %990 = vrot.lane.b32.xlu0 %v3141_v20, %s2790_s19 }
 0x12a   : > { %1082 = vrot.lane.b32.xlu1 %v3154_v27, %s2791_s2  ;;  %1080 = vrot.lane.b32.xlu0 %v3146_v21, %s2791_s2 }
 0x12e   : > { %1086 = vrot.lane.b32.xlu1 %v3151_v25, %s2791_s2  ;;  %1084 = vrot.lane.b32.xlu0 %v3141_v20, %s2791_s2 }
 0x132   : > { %1029 = vrot.lane.b32.xlu1 %v3173_v31, %s2790_s19  ;;  %1027 = vrot.lane.b32.xlu0 %v3176_v32, %s2790_s19 }
 0x136   : > { %1033 = vrot.lane.b32.xlu1 %v3186_v34, %s2790_s19  ;;  %1031 = vrot.lane.b32.xlu0 %v3189_v35, %s2790_s19 }
 0x13a   : > { %1176 = vrot.lane.b32.xlu1 %v3154_v27, %s2792_s29  ;;  %1174 = vrot.lane.b32.xlu0 %v3146_v21, %s2792_s29 }
 0x13e   : > { %1180 = vrot.lane.b32.xlu1 %v3151_v25, %s2792_s29  ;;  %1178 = vrot.lane.b32.xlu0 %v3141_v20, %s2792_s29 }
 0x142   : > { %1123 = vrot.lane.b32.xlu1 %v3173_v31, %s2791_s2  ;;  %1121 = vrot.lane.b32.xlu0 %v3176_v32, %s2791_s2 }
 0x146   : > { %1127 = vrot.lane.b32.xlu1 %v3186_v34, %s2791_s2  ;;  %1125 = vrot.lane.b32.xlu0 %v3189_v35, %s2791_s2 }
 0x154   : > { %v597_v43 = vpop.permute.xlu1 %596  ;;  %v593_v44 = vpop.permute.xlu0 %592 }
 0x155   : > { %v605_v47 = vsel %vm602_vm1, %v597_v43, %v593_v44  ;;  %v603_v48 = vsel %vm602_vm1, %v593_v44, %v597_v43 }
 0x156   : > { %v608_v51 = vmul.f32 %v603_v48, %v3294_v45  ;;  %v607_v52 = vmul.f32 %v605_v47, %v3297_v46  ;;  %v2290_v48 = vld [vmem:[%s4469_s7 + $0x4] ss:$8 sm:$0x3] }
 0x158   : > { %v599_v49 = vpop.permute.xlu1 %598  ;;  %v595_v50 = vpop.permute.xlu0 %594 }
 0x159   : > { %v606_v53 = vsel %vm602_vm1, %v599_v49, %v595_v50  ;;  %v604_v54 = vsel %vm602_vm1, %v595_v50, %v599_v49 }
 0x15a   : > { %v610_v55 = vmul.f32 %v604_v54, %v3294_v45  ;;  %v609_v56 = vmul.f32 %v606_v53, %v3297_v46 }
 0x15c   : > { %v3311_v57 = vpop.permute.xlu1 %690  ;;  %v3313_v58 = vpop.permute.xlu0 %688  ;;  %v628_v59 = vpack.c.bf16 %v610_v55, %v608_v51  ;;  %v627_v60 = vpack.c.bf16 %v609_v56, %v607_v52  ;;  %v3375_v51 = vrot.slane %v2290_v48, %v3287_v41  ;;  %v3378_v52 = vrot.slane %v2290_v48, %v3284_v40 }
 0x15e   : > { %1456 = vmatprep.subr.bf16.mxu1 %v628_v59 }
 0x15f   : > { %1457 = vmatpush1.bf16.msra.mxu1 %v627_v60 }
 0x160   : > { %v3315_v61 = vpop.permute.xlu1 %694  ;;  %v3317_v62 = vpop.permute.xlu0 %692 }
 0x164   : > { %v638_v63 = vpop.permute.xlu1 %637  ;;  %v636_v1 = vpop.permute.xlu0 %635 }
 0x168   : > { %v642_v2 = vpop.permute.xlu1 %641  ;;  %v640_v5 = vpop.permute.xlu0 %639 }
 0x169   : > { %v644_v3 = vsel %vm602_vm1, %v638_v63, %v642_v2  ;;  %v646_v4 = vsel %vm602_vm1, %v642_v2, %v638_v63  ;;  %v643_v8 = vsel %vm602_vm1, %v636_v1, %v640_v5  ;;  %v645_v9 = vsel %vm602_vm1, %v640_v5, %v636_v1 }
 0x16a   : > { %v649_v6 = vmul.f32 %v646_v4, %v3297_v46  ;;  %v650_v7 = vmul.f32 %v644_v3, %v3294_v45  ;;  %v647_v10 = vmul.f32 %v645_v9, %v3297_v46  ;;  %v648_v11 = vmul.f32 %v643_v8, %v3294_v45  ;;  %v2291_v4 = vld [vmem:[%s4469_s7 + $0x5] ss:$8 sm:$0x3] }
 0x16b   : > { %v3409_v9 = vrot.slane %v2291_v4, %v3287_v41 }
 0x16c   : > { %v3331_v12 = vpop.permute.xlu1 %784  ;;  %v667_v13 = vpack.c.bf16 %v649_v6, %v647_v10  ;;  %v3333_v14 = vpop.permute.xlu0 %782  ;;  %v668_v15 = vpack.c.bf16 %v650_v7, %v648_v11  ;;  %v3412_v10 = vrot.slane %v2291_v4, %v3284_v40 }
 0x16e   : > { %1542 = vmatprep.subr.bf16.mxu0 %v668_v15 }
 0x16f   : > { %1543 = vmatpush1.bf16.msra.mxu0 %v667_v13 }
 0x170   : > { %v3335_v16 = vpop.permute.xlu1 %788  ;;  %v3337_v17 = vpop.permute.xlu0 %786 }
 0x174   : > { %v3339_v18 = vpop.permute.xlu1 %731  ;;  %v3341_v19 = vpop.permute.xlu0 %729 }
 0x175   : > { %4553 = vst [vmem:[#allocation24_spill] sm:$0xff] %v3341_v19  ;;  %v700_v19 = vsel %vm696_vm5, %v3315_v61, %v3311_v57 }
 0x178   : > { %v3343_v22 = vpop.permute.xlu1 %735  ;;  %v3345_v23 = vpop.permute.xlu0 %733 }
 0x179   : > { %4554 = vst [vmem:[#allocation25_spill] sm:$0xff] %v3345_v23 }
 0x17c   : > { %v3347_v24 = vpop.permute.xlu1 %878  ;;  %v3349_v26 = vpop.permute.xlu0 %876 }
 0x180   : > { %v3351_v28 = vpop.permute.xlu1 %882  ;;  %v3353_v29 = vpop.permute.xlu0 %880 }
 0x184   : > { %v3355_v30 = vpop.permute.xlu1 %825  ;;  %v3357_v33 = vpop.permute.xlu0 %823 }
 0x185   : > { %4555 = vst [vmem:[#allocation26_spill] sm:$0xff] %v3355_v30  ;;  %4556 = vst [vmem:[#allocation27_spill] sm:$0xff] %v3357_v33 }
 0x188   : > { %v3359_v36 = vpop.permute.xlu1 %829  ;;  %v3361_v37 = vpop.permute.xlu0 %827 }
 0x189   : > { %4557 = vst [vmem:[#allocation28_spill] sm:$0xff] %v3359_v36  ;;  %4558 = vst [vmem:[#allocation29_spill] sm:$0xff] %v3361_v37 }
 0x18c   : > { %v3363_v42 = vpop.permute.xlu1 %919  ;;  %v3365_v43 = vpop.permute.xlu0 %917 }
 0x18d   : > { %4559 = vst [vmem:[#allocation30_spill] sm:$0xff] %v3363_v42  ;;  %4560 = vst [vmem:[#allocation31_spill] sm:$0xff] %v3365_v43 }
 0x190   : > { %v3367_v44 = vpop.permute.xlu1 %923  ;;  %v3369_v47 = vpop.permute.xlu0 %921 }
 0x191   : > { %4561 = vst [vmem:[#allocation32_spill] sm:$0xff] %v3367_v44  ;;  %4562 = vst [vmem:[#allocation33_spill] sm:$0xff] %v3369_v47 }
 0x194   : > { %v989_v49 = vpop.permute.xlu1 %988  ;;  %v987_v50 = vpop.permute.xlu0 %986 }
 0x198   : > { %v993_v53 = vpop.permute.xlu1 %992  ;;  %v991_v56 = vpop.permute.xlu0 %990 }
 0x199   : > { %v996_v54 = vsel %vm994_vm2, %v989_v49, %v993_v53  ;;  %v998_v55 = vsel %vm994_vm2, %v993_v53, %v989_v49  ;;  %v995_v63 = vsel %vm994_vm2, %v987_v50, %v991_v56  ;;  %v997_v1 = vsel %vm994_vm2, %v991_v56, %v987_v50 }
 0x19a   : > { %v3386_v59 = vmul.f32 %v996_v54, %v3375_v51  ;;  %v3389_v60 = vmul.f32 %v998_v55, %v3378_v52  ;;  %v3396_v2 = vmul.f32 %v995_v63, %v3375_v51  ;;  %v3399_v3 = vmul.f32 %v997_v1, %v3378_v52 }
 0x19c   : > { %v1083_v5 = vpop.permute.xlu1 %1082  ;;  %v1081_v6 = vpop.permute.xlu0 %1080 }
 0x1a0   : > { %v1087_v11 = vpop.permute.xlu1 %1086  ;;  %v1085_v48 = vpop.permute.xlu0 %1084 }
 0x1a1   : > { %v1090_v13 = vsel %vm1088_vm3, %v1083_v5, %v1087_v11  ;;  %v1092_v15 = vsel %vm1088_vm3, %v1087_v11, %v1083_v5  ;;  %v1089_v53 = vsel %vm1088_vm3, %v1081_v6, %v1085_v48  ;;  %v1091_v54 = vsel %vm1088_vm3, %v1085_v48, %v1081_v6 }
 0x1a2   : > { %v3420_v49 = vmul.f32 %v1090_v13, %v3409_v9  ;;  %v3423_v50 = vmul.f32 %v1092_v15, %v3412_v10  ;;  %v3430_v55 = vmul.f32 %v1089_v53, %v3409_v9  ;;  %v3433_v56 = vmul.f32 %v1091_v54, %v3412_v10 }
 0x1a4   : > { %4563 = vst [vmem:[#allocation34_spill] sm:$0xff] %v3420_v49  ;;  %4564 = vst [vmem:[#allocation35_spill] sm:$0xff] %v3423_v50  ;;  %v1030_v63 = vpop.permute.xlu1 %1029  ;;  %v1028_v1 = vpop.permute.xlu0 %1027 }
 0x1a5   : > { %4565 = vst [vmem:[#allocation36_spill] sm:$0xff] %v3430_v55  ;;  %4566 = vst [vmem:[#allocation37_spill] sm:$0xff] %v3433_v56  ;;  %v697_v55 = vsel %vm696_vm5, %v3313_v58, %v3317_v62 }
 0x1a8   : > { %v1034_v11 = vpop.permute.xlu1 %1033  ;;  %v1032_v15 = vpop.permute.xlu0 %1031 }
 0x1a9   : > { %v1036_v13 = vsel %vm994_vm2, %v1030_v63, %v1034_v11  ;;  %v1038_v6 = vsel %vm994_vm2, %v1034_v11, %v1030_v63  ;;  %v1035_v54 = vsel %vm994_vm2, %v1028_v1, %v1032_v15  ;;  %v1037_v0 = vsel %vm994_vm2, %v1032_v15, %v1028_v1  ;;  %v2292_v63 = vld [vmem:[%s4469_s7 + $0x6] ss:$8 sm:$0x3] }
 0x1aa   : > { %v3444_v48 = vmul.f32 %v1036_v13, %v3375_v51  ;;  %v3447_v53 = vmul.f32 %v1038_v6, %v3378_v52  ;;  %v3454_v5 = vmul.f32 %v1035_v54, %v3375_v51  ;;  %v3457_v4 = vmul.f32 %v1037_v0, %v3378_v52 }
 0x1ab   : > { %v3467_v1 = vrot.slane %v2292_v63, %v3287_v41  ;;  %v3470_v15 = vrot.slane %v2292_v63, %v3284_v40 }
 0x1ac   : > { %4567 = vst [vmem:[#allocation38_spill] sm:$0xff] %v3444_v48  ;;  %4568 = vst [vmem:[#allocation39_spill] sm:$0xff] %v3447_v53  ;;  %v1177_v11 = vpop.permute.xlu1 %1176  ;;  %v1175_v6 = vpop.permute.xlu0 %1174 }
 0x1ad   : > { %4569 = vst [vmem:[#allocation40_spill] sm:$0xff] %v3454_v5  ;;  %4570 = vst [vmem:[#allocation41_spill] sm:$0xff] %v3457_v4 }
 0x1ae   : > { %4571 = vst [vmem:[#allocation42_spill] sm:$0xff] %v3467_v1  ;;  %4572 = vst [vmem:[#allocation43_spill] sm:$0xff] %v3470_v15 }
 0x1b0   : > { %v1181_v0 = vpop.permute.xlu1 %1180  ;;  %v1179_v13 = vpop.permute.xlu0 %1178 }
 0x1b1   : > { %v1184_v54 = vsel %vm1182_vm4, %v1177_v11, %v1181_v0  ;;  %v1186_v7 = vsel %vm1182_vm4, %v1181_v0, %v1177_v11  ;;  %v1183_v63 = vsel %vm1182_vm4, %v1175_v6, %v1179_v13  ;;  %v1185_v5 = vsel %vm1182_vm4, %v1179_v13, %v1175_v6 }
 0x1b2   : > { %v3478_v38 = vmul.f32 %v1184_v54, %v3467_v1  ;;  %v3481_v8 = vmul.f32 %v1186_v7, %v3470_v15  ;;  %v3488_v48 = vmul.f32 %v1183_v63, %v3467_v1  ;;  %v3491_v4 = vmul.f32 %v1185_v5, %v3470_v15 }
 0x1b4   : > { %4573 = vst [vmem:[#allocation44_spill] sm:$0xff] %v3478_v38  ;;  %4574 = vst [vmem:[#allocation45_spill] sm:$0xff] %v3481_v8  ;;  %v1124_v11 = vpop.permute.xlu1 %1123  ;;  %v1122_v0 = vpop.permute.xlu0 %1121  ;;  %v2287_v8 = vld [vmem:[%s4469_s7 + $0x1] ss:$8 sm:$0x3] }
 0x1b5   : > { %4575 = vst [vmem:[#allocation46_spill] sm:$0xff] %v3488_v48  ;;  %4576 = vst [vmem:[#allocation47_spill] sm:$0xff] %v3491_v4 }
 0x1b8   : > { %v1128_v53 = vpop.permute.xlu1 %1127  ;;  %v1126_v6 = vpop.permute.xlu0 %1125 }
 0x1b9   : > { %v1130_v43 = vsel %vm1088_vm3, %v1124_v11, %v1128_v53  ;;  %v1132_v13 = vsel %vm1088_vm3, %v1128_v53, %v1124_v11  ;;  %v1129_v54 = vsel %vm1088_vm3, %v1122_v0, %v1126_v6  ;;  %v1131_v7 = vsel %vm1088_vm3, %v1126_v6, %v1122_v0  ;;  %v2507_v6 = vld [vmem:[%s4465_s3 + $0x4] ss:$12 sps:$4 sm:$0xff]  }
 0x1ba   : > { %v3502_v63 = vmul.f32 %v1130_v43, %v3409_v9  ;;  %v3505_v5 = vmul.f32 %v1132_v13, %v3412_v10  ;;  %v3512_v47 = vmul.f32 %v1129_v54, %v3409_v9  ;;  %v3515_v42 = vmul.f32 %v1131_v7, %v3412_v10  ;;  %1488 = vmatprep.mubr.bf16.mxu1 %v2507_v6 }
 0x1bb   : > { %1574 = vmatprep.mubr.bf16.mxu0 %v2507_v6 }
 0x1bc   : > { %4577 = vst [vmem:[#allocation48_spill] sm:$0xff] %v3502_v63  ;;  %4578 = vst [vmem:[#allocation49_spill] sm:$0xff] %v3505_v5  ;;  %v4499_v5 = vmov 0  }
 0x1bd   : > { %4579 = vst [vmem:[#allocation50_spill] sm:$0xff] %v3512_v47  ;;  %4580 = vst [vmem:[#allocation51_spill] sm:$0xff] %v3515_v42  ;;  %2503 = vset.pattern.permute.xlu0 %v4499_v5  ;;  %2504 = vset.pattern.permute.xlu1 %v4499_v5 }
 0x1c2   : > { %v3521_v11 = vpop.f32.mrb[0].mxu0 }
 0x1c3   : > { %611 = vrot.lane.b32.xlu0 %v3521_v11, %s2786_s15  ;;  %v3525_v13 = vpop.f32.mrb[1].mxu0 }
 0x1c6   : > { %v3527_v0 = vpop.f32.mrb[2].mxu0 }
 0x1c7   : > { %705 = vrot.lane.b32.xlu0 %v3521_v11, %s2787_s23  ;;  %613 = vrot.lane.b32.xlu1 %v3527_v0, %s2786_s15  ;;  %v3533_v54 = vpop.f32.mrb[3].mxu0 }
 0x1ca   : > { %v3539_v53 = vpop.f32.mrb[4].mxu0 }
 0x1cb   : > { %4581 = vst [vmem:[#allocation52_spill] sm:$0xff] %v3539_v53  ;;  %799 = vrot.lane.b32.xlu0 %v3521_v11, %s2788_s20  ;;  %707 = vrot.lane.b32.xlu1 %v3527_v0, %s2787_s23  ;;  %v3545_v43 = vpop.f32.mrb[5].mxu0 }
 0x1cc   : > { %4582 = vst [vmem:[#allocation53_spill] sm:$0xff] %v3545_v43 }
 0x1ce   : > { %v3547_v47 = vpop.f32.mrb[6].mxu0 }
 0x1cf   : > { %4583 = vst [vmem:[#allocation54_spill] sm:$0xff] %v3547_v47  ;;  %893 = vrot.lane.b32.xlu0 %v3521_v11, %s2789_s9  ;;  %801 = vrot.lane.b32.xlu1 %v3527_v0, %s2788_s20  ;;  %v3553_v7 = vpop.f32.mrb[7].mxu0 }
 0x1d0   : > { %4584 = vst [vmem:[#allocation55_spill] sm:$0xff] %v3553_v7 }
 0x1d3   : > { %1003 = vrot.lane.b32.xlu0 %v3521_v11, %s2790_s19  ;;  %895 = vrot.lane.b32.xlu1 %v3527_v0, %s2789_s9 }
 0x1d7   : > { %1097 = vrot.lane.b32.xlu0 %v3521_v11, %s2791_s2  ;;  %1005 = vrot.lane.b32.xlu1 %v3527_v0, %s2790_s19 }
 0x1db   : > { %1191 = vrot.lane.b32.xlu0 %v3521_v11, %s2792_s29  ;;  %1099 = vrot.lane.b32.xlu1 %v3527_v0, %s2791_s2 }
 0x1df   : > { %615 = vrot.lane.b32.xlu0 %v3525_v13, %s2786_s15  ;;  %1193 = vrot.lane.b32.xlu1 %v3527_v0, %s2792_s29 }
 0x1e3   : > { %709 = vrot.lane.b32.xlu0 %v3525_v13, %s2787_s23  ;;  %617 = vrot.lane.b32.xlu1 %v3533_v54, %s2786_s15 }
 0x1e7   : > { %803 = vrot.lane.b32.xlu0 %v3525_v13, %s2788_s20  ;;  %711 = vrot.lane.b32.xlu1 %v3533_v54, %s2787_s23 }
 0x1eb   : > { %897 = vrot.lane.b32.xlu0 %v3525_v13, %s2789_s9  ;;  %805 = vrot.lane.b32.xlu1 %v3533_v54, %s2788_s20 }
 0x1ef   : > { %1007 = vrot.lane.b32.xlu0 %v3525_v13, %s2790_s19  ;;  %899 = vrot.lane.b32.xlu1 %v3533_v54, %s2789_s9 }
 0x1f3   : > { %1101 = vrot.lane.b32.xlu0 %v3525_v13, %s2791_s2  ;;  %1009 = vrot.lane.b32.xlu1 %v3533_v54, %s2790_s19 }
 0x1f7   : > { %1195 = vrot.lane.b32.xlu0 %v3525_v13, %s2792_s29  ;;  %1103 = vrot.lane.b32.xlu1 %v3533_v54, %s2791_s2 }
 0x1fb   : > { %1197 = vrot.lane.b32.xlu1 %v3533_v54, %s2792_s29  ;;  %651 = vrot.lane.b32.xlu0 %v3539_v53, %s2786_s15 }
 0x1ff   : > { %745 = vrot.lane.b32.xlu0 %v3539_v53, %s2787_s23  ;;  %653 = vrot.lane.b32.xlu1 %v3547_v47, %s2786_s15 }
 0x203   : > { %839 = vrot.lane.b32.xlu0 %v3539_v53, %s2788_s20  ;;  %747 = vrot.lane.b32.xlu1 %v3547_v47, %s2787_s23 }
 0x207   : > { %933 = vrot.lane.b32.xlu0 %v3539_v53, %s2789_s9  ;;  %841 = vrot.lane.b32.xlu1 %v3547_v47, %s2788_s20 }
 0x20b   : > { %1043 = vrot.lane.b32.xlu0 %v3539_v53, %s2790_s19  ;;  %935 = vrot.lane.b32.xlu1 %v3547_v47, %s2789_s9 }
 0x20f   : > { %1137 = vrot.lane.b32.xlu0 %v3539_v53, %s2791_s2  ;;  %1045 = vrot.lane.b32.xlu1 %v3547_v47, %s2790_s19 }
 0x213   : > { %655 = vrot.lane.b32.xlu0 %v3545_v43, %s2786_s15  ;;  %1139 = vrot.lane.b32.xlu1 %v3547_v47, %s2791_s2 }
 0x217   : > { %1268 = vrot.lane.b32.xlu0 %v3146_v21, %s2793_s30  ;;  %657 = vrot.lane.b32.xlu1 %v3553_v7, %s2786_s15 }
 0x21b   : > { %749 = vrot.lane.b32.xlu0 %v3545_v43, %s2787_s23  ;;  %1270 = vrot.lane.b32.xlu1 %v3154_v27, %s2793_s30 }
 0x21f   : > { %843 = vrot.lane.b32.xlu0 %v3545_v43, %s2788_s20  ;;  %751 = vrot.lane.b32.xlu1 %v3553_v7, %s2787_s23 }
 0x223   : > { %937 = vrot.lane.b32.xlu0 %v3545_v43, %s2789_s9  ;;  %1274 = vrot.lane.b32.xlu1 %v3151_v25, %s2793_s30 }
 0x227   : > { %1047 = vrot.lane.b32.xlu0 %v3545_v43, %s2790_s19  ;;  %845 = vrot.lane.b32.xlu1 %v3553_v7, %s2788_s20  ;;  %s4394_s20 = scalar_lea.vmem [#allocation14], %s2276_s26  ;;  %s2317_s26 = sshll.u32 %s2868_s13, 10 }
 0x228   : > { %s2113_s13 = scalar_lea.sflag [#allocation5], %s3107_s28 }
 0x22b   : > { %1141 = vrot.lane.b32.xlu0 %v3545_v43, %s2791_s2  ;;  %1217 = vrot.lane.b32.xlu1 %v3173_v31, %s2792_s29 }
 0x22f   : > { %1272 = vrot.lane.b32.xlu0 %v3141_v20, %s2793_s30  ;;  %939 = vrot.lane.b32.xlu1 %v3553_v7, %s2789_s9  ;;  %s2127_s9 = sshll.u32 %s4394_s20, 4  ;;  %s4415_s9 = int_to_ptr.vmem [resolvable:$true] %s2127_s9 }
 0x230   : > { %s2689_s6 = scalar_lea.vmem %s4415_s9, 1024  ;;  %p2696_p10 = scmp.lt.s32.totalorder %s4415_s9, %s2694_s25 }
 0x231   : > { %p2690_p0 = scmp.ne.s32.totalorder %s4415_s9, %s2689_s6  ;;  %p2697_p5 = scmp.lt.s32.totalorder %s2695_s0, %s2689_s6 }
 0x233   : > { %1215 = vrot.lane.b32.xlu0 %v3176_v32, %s2792_s29  ;;  %1221 = vrot.lane.b32.xlu1 %v3186_v34, %s2792_s29  ;;  %p2691_p6 = pnand %p2690_p0, %p3012_p3  ;;  %p2698_p9 = por %p2697_p5, %p2696_p10 }
 0x235   : > { %v612_v63 = vpop.permute.xlu0 %611  ;;  %p2692_p8 = pneg %p2691_p6 }
 0x237   : > { %1219 = vrot.lane.b32.xlu0 %v3189_v35, %s2792_s29  ;;  %1287 = vrot.lane.b32.xlu1 %v3527_v0, %s2793_s30  ;;  %p2699_p4 = pnand %p2698_p9, %p2692_p8 }
 0x239   : > { %v3666_v6 = vpop.permute.xlu0 %705  ;;  %v614_v42 = vpop.permute.xlu1 %613 }
 0x23b   : > { %1285 = vrot.lane.b32.xlu0 %v3521_v11, %s2793_s30  ;;  %1291 = vrot.lane.b32.xlu1 %v3533_v54, %s2793_s30 }
 0x23d   : > { %v3674_v44 = vpop.permute.xlu0 %799  ;;  %v708_v48 = vpop.permute.xlu1 %707 }
 0x23f   : > { %1289 = vrot.lane.b32.xlu0 %v3525_v13, %s2793_s30  ;;  %1049 = vrot.lane.b32.xlu1 %v3553_v7, %s2790_s19 }
 0x241   : > { %v3680_v38 = vpop.permute.xlu0 %893  ;;  %v3682_v33 = vpop.permute.xlu1 %801 }
 0x243   : > { %1231 = vrot.lane.b32.xlu0 %v3539_v53, %s2792_s29  ;;  %1233 = vrot.lane.b32.xlu1 %v3547_v47, %s2792_s29 }
 0x245   : > { %v3688_v5 = vpop.permute.xlu0 %1003  ;;  %v3690_v37 = vpop.permute.xlu1 %895 }
 0x247   : > { %1235 = vrot.lane.b32.xlu0 %v3545_v43, %s2792_s29  ;;  %1143 = vrot.lane.b32.xlu1 %v3553_v7, %s2791_s2 }
 0x249   : > { %v3696_v1 = vpop.permute.xlu0 %1097  ;;  %v3698_v30 = vpop.permute.xlu1 %1005 }
 0x24b   : > { %1309 = vrot.lane.b32.xlu0 %v3176_v32, %s2793_s30  ;;  %1311 = vrot.lane.b32.xlu1 %v3173_v31, %s2793_s30  ;;  %v3717_v32 = vrot.slane %v2287_v8, %v3284_v40 }
 0x24d   : > { %v3704_v36 = vpop.permute.xlu0 %1191  ;;  %v3706_v4 = vpop.permute.xlu1 %1099  ;;  %v702_v50 = vmul.f32 %v697_v55, %v3717_v32 }
 0x24e   : > { %4585 = vst [vmem:[#allocation56_spill] sm:$0xff] %v3704_v36  ;;  %v698_v36 = vsel %vm696_vm5, %v3311_v57, %v3315_v61 }
 0x24f   : > { %1313 = vrot.lane.b32.xlu0 %v3189_v35, %s2793_s30  ;;  %1237 = vrot.lane.b32.xlu1 %v3553_v7, %s2792_s29  ;;  %v704_v23 = vmul.f32 %v698_v36, %v3717_v32  ;;  %s4638_s29 = sld [smem:[#allocation62_spill]] }
 0x251   : > { %v616_v31 = vpop.permute.xlu0 %615  ;;  %v3719_v15 = vpop.permute.xlu1 %1193 }
 0x252   : > { %4586 = vst [vmem:[#allocation57_spill] sm:$0xff] %v3719_v15  ;;  %v619_v35 = vsel %vm602_vm1, %v612_v63, %v616_v31  ;;  %v621_v49 = vsel %vm602_vm1, %v616_v31, %v612_v63  ;;  %v3738_v15 = vrot.slane %v2287_v8, %v3287_v41 }
 0x253   : > { %1325 = vrot.lane.b32.xlu0 %v3539_v53, %s2793_s30  ;;  %1315 = vrot.lane.b32.xlu1 %v3186_v34, %s2793_s30  ;;  %v699_v34 = vsel %vm696_vm5, %v3317_v62, %v3313_v58  ;;  %v623_v31 = vmul.f32 %v621_v49, %v3297_v46  ;;  %v624_v57 = vmul.f32 %v619_v35, %v3294_v45  ;;  %v2288_v58 = vld [vmem:[%s4469_s7 + $0x2] ss:$8 sm:$0x3] }
 0x254   : > { %v701_v35 = vmul.f32 %v699_v34, %v3738_v15  ;;  %v722_v34 = vpack.c.bf16 %v704_v23, %v702_v50 }
 0x255   : > { %v710_v53 = vpop.permute.xlu0 %709  ;;  %v618_v56 = vpop.permute.xlu1 %617  ;;  %s4413_s14 = scalar_lea.hbm %s4638_s29, %s2317_s26 }
 0x256   : > { %v620_v8 = vsel %vm602_vm1, %v614_v42, %v618_v56  ;;  %v622_v63 = vsel %vm602_vm1, %v618_v56, %v614_v42  ;;  %v703_v56 = vmul.f32 %v700_v19, %v3738_v15 }
 0x257   : > { %v625_v61 = vmul.f32 %v622_v63, %v3297_v46  ;;  %v626_v36 = vmul.f32 %v620_v8, %v3294_v45  ;;  %1329 = vrot.lane.b32.xlu0 %v3545_v43, %s2793_s30  ;;  %1327 = vrot.lane.b32.xlu1 %v3547_v47, %s2793_s30  ;;  %v713_v8 = vsel %vm696_vm5, %v3666_v6, %v710_v53  ;;  %v1425_v47 = vld [vmem:[%s4466_s4] sm:$0xff] }
 0x258   : > { %v3777_v43 = vrot.slane %v2288_v58, %v3284_v40  ;;  %v718_v23 = vmul.f32 %v713_v8, %v3717_v32 }
 0x259   : > { %v804_v62 = vpop.permute.xlu0 %803  ;;  %v712_v42 = vpop.permute.xlu1 %711  ;;  %v632_v49 = vpack.c.bf16 %v626_v36, %v624_v57  ;;  %v631_v55 = vpack.c.bf16 %v625_v61, %v623_v31  ;;  %v792_v57 = vsel %vm790_vm6, %v3331_v12, %v3335_v16  ;;  %v791_v61 = vsel %vm790_vm6, %v3333_v14, %v3337_v17 }
 0x25a   : > { %v714_v63 = vsel %vm696_vm5, %v708_v48, %v712_v42  ;;  %v716_v31 = vsel %vm696_vm5, %v712_v42, %v708_v48  ;;  %v715_v48 = vsel %vm696_vm5, %v710_v53, %v3666_v6  ;;  %v1426_v42 = vld [vmem:[%s4466_s4 + $0x8] sm:$0xff]  ;;  %v721_v6 = vpack.c.bf16 %v703_v56, %v701_v35 }
 0x25b   : > { %v720_v19 = vmul.f32 %v714_v63, %v3717_v32  ;;  %1458 = vmatprep.subr.bf16.mxu1 %v632_v49  ;;  %1331 = vrot.lane.b32.xlu1 %v3553_v7, %s2793_s30  ;;  %v3800_v49 = vrot.slane %v2288_v58, %v3287_v41  ;;  %v719_v53 = vmul.f32 %v716_v31, %v3738_v15  ;;  %v2289_v58 = vld [vmem:[%s4469_s7 + $0x3] ss:$8 sm:$0x3] }
 0x25c   : > { %1459 = vmatpush1.bf16.msra.mxu1 %v631_v55  ;;  %1429 = vperm.xlu0 %2503, %v1425_v47   ;;  %v794_v55 = vsel %vm790_vm6, %v3335_v16, %v3331_v12  ;;  %v798_v8 = vmul.f32 %v792_v57, %v3777_v43  ;;  %v793_v47 = vsel %vm790_vm6, %v3337_v17, %v3333_v14 }
 0x25d   : > { %v898_v50 = vpop.permute.xlu0 %897  ;;  %1460 = vmatprep.subr.bf16.mxu1 %v722_v34  ;;  %v806_v36 = vpop.permute.xlu1 %805  ;;  %v796_v63 = vmul.f32 %v791_v61, %v3777_v43  ;;  %v726_v34 = vpack.c.bf16 %v720_v19, %v718_v23  ;;  %v717_v7 = vmul.f32 %v715_v48, %v3738_v15  ;;  %v797_v17 = vmul.f32 %v794_v55, %v3800_v49 }
 0x25e   : > { %v808_v12 = vsel %vm790_vm6, %v3682_v33, %v806_v36  ;;  %v795_v56 = vmul.f32 %v793_v47, %v3800_v49  ;;  %v807_v35 = vsel %vm790_vm6, %v3674_v44, %v804_v62  ;;  %v3829_v19 = vrot.slane %v2289_v58, %v3284_v40 }
 0x25f   : > { %1434 = vperm.xlu1 %2504, %v1426_v42   ;;  %v725_v31 = vpack.c.bf16 %v719_v53, %v717_v7  ;;  %v810_v57 = vsel %vm790_vm6, %v806_v36, %v3682_v33  ;;  %v814_v61 = vmul.f32 %v808_v12, %v3777_v43  ;;  %v816_v48 = vpack.c.bf16 %v798_v8, %v796_v63 }
 0x260   : > { %1461 = vmatpush1.bf16.msra.mxu1 %v721_v6  ;;  %v886_v23 = vsel %vm884_vm7, %v3347_v24, %v3351_v28  ;;  %v885_v7 = vsel %vm884_vm7, %v3349_v26, %v3353_v29  ;;  %v809_v42 = vsel %vm790_vm6, %v804_v62, %v3674_v44  ;;  %v812_v33 = vmul.f32 %v807_v35, %v3777_v43 }
 0x261   : > { %v3821_v16 = vpop.permute.xlu0 %1007  ;;  %1462 = vmatprep.subr.bf16.mxu1 %v726_v34  ;;  %v900_v14 = vpop.permute.xlu1 %899  ;;  %v3850_v53 = vrot.slane %v2289_v58, %v3287_v41  ;;  %v888_v6 = vsel %vm884_vm7, %v3351_v28, %v3347_v24  ;;  %v813_v8 = vmul.f32 %v810_v57, %v3800_v49  ;;  %v815_v47 = vpack.c.bf16 %v797_v17, %v795_v56 }
 0x262   : > { %v892_v63 = vmul.f32 %v886_v23, %v3829_v19  ;;  %v887_v44 = vsel %vm884_vm7, %v3353_v29, %v3349_v26  ;;  %v890_v62 = vmul.f32 %v885_v7, %v3829_v19  ;;  %v820_v34 = vpack.c.bf16 %v814_v61, %v812_v33 }
 0x263   : > { %v811_v58 = vmul.f32 %v809_v42, %v3800_v49  ;;  %v902_v12 = vsel %vm884_vm7, %v3690_v37, %v900_v14  ;;  %v891_v17 = vmul.f32 %v888_v6, %v3850_v53  ;;  %v889_v56 = vmul.f32 %v887_v44, %v3850_v53 }
 0x264   : > { %1463 = vmatpush1.bf16.msra.mxu1 %v725_v31  ;;  %v901_v26 = vsel %vm884_vm7, %v3680_v38, %v898_v50  ;;  %v904_v35 = vsel %vm884_vm7, %v900_v14, %v3690_v37  ;;  %v908_v31 = vmul.f32 %v902_v12, %v3829_v19  ;;  %v910_v57 = vpack.c.bf16 %v892_v63, %v890_v62 }
 0x265   : > { %v3847_v36 = vpop.permute.xlu0 %1101  ;;  %1464 = vmatprep.subr.bf16.mxu1 %v816_v48  ;;  %v1010_v55 = vpop.permute.xlu1 %1009  ;;  %v819_v29 = vpack.c.bf16 %v813_v8, %v811_v58  ;;  %v903_v61 = vsel %vm884_vm7, %v898_v50, %v3680_v38  ;;  %v906_v48 = vmul.f32 %v901_v26, %v3829_v19  ;;  %v907_v42 = vmul.f32 %v904_v35, %v3850_v53 }
 0x266   : > { %v909_v33 = vpack.c.bf16 %v891_v17, %v889_v56  ;;  %v905_v37 = vmul.f32 %v903_v61, %v3850_v53  ;;  %v958_v38 = vpack.c.bf16 %v3151_v25, %v3141_v20  ;;  %v1014_v62 = vsel %vm994_vm2, %v1010_v55, %v3698_v30  ;;  %v4591_v61 = vld [vmem:[#allocation35_spill] sm:$0xff] }
 0x267   : > { %v914_v6 = vpack.c.bf16 %v908_v31, %v906_v48  ;;  %v1018_v58 = vmul.f32 %v1014_v62, %v3378_v52  ;;  %v4588_v12 = vpack.c.bf16 %v3527_v0, %v3521_v11  ;;  %v4589_v17 = vpack.c.bf16 %v3389_v60, %v3399_v3  ;;  %v4592_v48 = vld [vmem:[#allocation37_spill] sm:$0xff] }
 0x268   : > { %1465 = vmatpush1.bf16.msra.mxu1 %v815_v47  ;;  %v913_v50 = vpack.c.bf16 %v907_v42, %v905_v37  ;;  %v957_v47 = vpack.c.bf16 %v3154_v27, %v3146_v21  ;;  %v1013_v21 = vsel %vm994_vm2, %v3821_v16, %v3688_v5  ;;  %v1012_v27 = vsel %vm994_vm2, %v3698_v30, %v1010_v55 }
 0x269   : > { %v3867_v24 = vpop.permute.xlu0 %1195  ;;  %1466 = vmatprep.subr.bf16.mxu1 %v820_v34  ;;  %v1104_v28 = vpop.permute.xlu1 %1103  ;;  %v4587_v34 = vpack.c.bf16 %v3533_v54, %v3525_v13  ;;  %v1011_v13 = vsel %vm994_vm2, %v3688_v5, %v3821_v16  ;;  %v1016_v54 = vmul.f32 %v1013_v21, %v3378_v52  ;;  %v1017_v55 = vmul.f32 %v1012_v27, %v3375_v51 }
 0x26a   : > { %v1015_v11 = vmul.f32 %v1011_v13, %v3375_v51  ;;  %v1108_v0 = vsel %vm1088_vm3, %v1104_v28, %v3706_v4  ;;  %v4590_v5 = vpack.c.bf16 %v3386_v59, %v3396_v2  ;;  %v1107_v16 = vsel %vm1088_vm3, %v3847_v36, %v3696_v1 }
 0x26b   : > { %v1024_v26 = vpack.c.bf16 %v1018_v58, %v1016_v54  ;;  %v1112_v31 = vmul.f32 %v1108_v0, %v3412_v10  ;;  %v1105_v59 = vsel %vm1088_vm3, %v3696_v1, %v3847_v36  ;;  %v738_v2 = vsel %vm696_vm5, %v3339_v18, %v3343_v22  ;;  %v4597_v58 = vld [vmem:[#allocation34_spill] sm:$0xff] }
 0x26c   : > { %1467 = vmatpush1.bf16.msra.mxu1 %v819_v29  ;;  %v1106_v29 = vsel %vm1088_vm3, %v3706_v4, %v1104_v28  ;;  %v1023_v35 = vpack.c.bf16 %v1017_v55, %v1015_v11  ;;  %v1110_v4 = vmul.f32 %v1107_v16, %v3412_v10  ;;  %v4593_v42 = vpack.c.bf16 %v4591_v61, %v4592_v48  ;;  %v4600_v55 = vld [vmem:[#allocation56_spill] sm:$0xff]  ;;  %v4601_v16 = vld [vmem:[#allocation43_spill] sm:$0xff]  ;;  %v4602_v48 = vld [vmem:[#allocation45_spill] sm:$0xff] }
 0x26d   : > { %1468 = vmatprep.subr.bf16.mxu1 %v910_v57  ;;  %v3882_v23 = vpop.permute.xlu1 %1197  ;;  %v652_v7 = vpop.permute.xlu0 %651  ;;  %v740_v57 = vsel %vm696_vm5, %v3343_v22, %v3339_v18  ;;  %v1111_v28 = vmul.f32 %v1106_v29, %v3409_v9  ;;  %v1109_v22 = vmul.f32 %v1105_v59, %v3409_v9 }
 0x26e   : > { %v743_v62 = vmul.f32 %v740_v57, %v3738_v15 }
 0x270   : > { %1469 = vmatpush1.bf16.msra.mxu1 %v909_v33  ;;  %v4594_v33 = vld [vmem:[#allocation25_spill] sm:$0xff] }
 0x271   : > { %1470 = vmatprep.subr.bf16.mxu1 %v914_v6  ;;  %v3886_v14 = vpop.permute.xlu0 %745  ;;  %v3888_v8 = vpop.permute.xlu1 %653  ;;  %v4595_v6 = vld [vmem:[#allocation24_spill] sm:$0xff] }
 0x272   : > { %v737_v37 = vsel %vm696_vm5, %v4595_v6, %v4594_v33  ;;  %v739_v18 = vsel %vm696_vm5, %v4594_v33, %v4595_v6 }
 0x273   : > { %v741_v54 = vmul.f32 %v739_v18, %v3738_v15  ;;  %v4607_v18 = vld [vmem:[#allocation42_spill] sm:$0xff] }
 0x274   : > { %1471 = vmatpush1.bf16.msra.mxu1 %v913_v50 }
 0x275   : > { %v3894_v63 = vpop.permute.xlu0 %839  ;;  %v3896_v44 = vpop.permute.xlu1 %747  ;;  %1472 = vmatprep.subr.bf16.mxu1 %v958_v38  ;;  %v4596_v38 = vld [vmem:[#allocation57_spill] sm:$0xff] }
 0x276   : > { %v1202_v50 = vsel %vm1182_vm4, %v3882_v23, %v4596_v38 }
 0x277   : > { %v1206_v29 = vmul.f32 %v1202_v50, %v4601_v16  ;;  %v4609_v50 = vld [vmem:[#allocation27_spill] sm:$0xff] }
 0x278   : > { %1473 = vmatpush1.bf16.msra.mxu1 %v957_v47  ;;  %v1118_v47 = vpack.c.bf16 %v1112_v31, %v1110_v4 }
 0x279   : > { %1474 = vmatprep.subr.bf16.mxu1 %v4587_v34  ;;  %v3904_v20 = vpop.permute.xlu0 %933  ;;  %v3906_v25 = vpop.permute.xlu1 %841  ;;  %v744_v34 = vmul.f32 %v738_v2, %v3717_v32 }
 0x27c   : > { %1475 = vmatpush1.bf16.msra.mxu1 %v4588_v12  ;;  %v4598_v12 = vld [vmem:[#allocation36_spill] sm:$0xff] }
 0x27d   : > { %1476 = vmatprep.subr.bf16.mxu1 %v4589_v17  ;;  %v3927_v56 = vpop.permute.xlu0 %1043  ;;  %v3929_v30 = vpop.permute.xlu1 %935  ;;  %v4599_v13 = vpack.c.bf16 %v4597_v58, %v4598_v12  ;;  %v742_v17 = vmul.f32 %v737_v37, %v3717_v32  ;;  %v4606_v37 = vld [vmem:[#allocation26_spill] sm:$0xff] }
 0x280   : > { %1477 = vmatpush1.bf16.msra.mxu1 %v4590_v5  ;;  %v1117_v5 = vpack.c.bf16 %v1111_v28, %v1109_v22 }
 0x281   : > { %1478 = vmatprep.subr.bf16.mxu1 %v1024_v26  ;;  %v3939_v60 = vpop.permute.xlu0 %1137  ;;  %v3941_v3 = vpop.permute.xlu1 %1045  ;;  %v1201_v26 = vsel %vm1182_vm4, %v3867_v24, %v4600_v55 }
 0x282   : > { %v1204_v28 = vmul.f32 %v1201_v26, %v4601_v16 }
 0x284   : > { %1479 = vmatpush1.bf16.msra.mxu1 %v1023_v35 }
 0x285   : > { %1480 = vmatprep.subr.bf16.mxu1 %v4593_v42  ;;  %v656_v1 = vpop.permute.xlu0 %655  ;;  %v3968_v36 = vpop.permute.xlu1 %1139  ;;  %v4603_v42 = vld [vmem:[#allocation47_spill] sm:$0xff] }
 0x286   : > { %v659_v21 = vsel %vm602_vm1, %v652_v7, %v656_v1  ;;  %v661_v27 = vsel %vm602_vm1, %v656_v1, %v652_v7  ;;  %v1200_v7 = vsel %vm1182_vm4, %v4596_v38, %v3882_v23  ;;  %v1199_v23 = vsel %vm1182_vm4, %v4600_v55, %v3867_v24  ;;  %v4608_v24 = vld [vmem:[#allocation29_spill] sm:$0xff]  ;;  %v4610_v55 = vld [vmem:[#allocation44_spill] sm:$0xff] }
 0x287   : > { %v663_v59 = vmul.f32 %v661_v27, %v3297_v46  ;;  %v664_v2 = vmul.f32 %v659_v21, %v3294_v45  ;;  %v1205_v22 = vmul.f32 %v1200_v7, %v4607_v18  ;;  %v761_v38 = vpack.c.bf16 %v743_v62, %v741_v54  ;;  %v4611_v62 = vld [vmem:[#allocation46_spill] sm:$0xff] }
 0x288   : > { %1481 = vmatpush1.bf16.msra.mxu1 %v4599_v13  ;;  %v1212_v21 = vpack.c.bf16 %v1206_v29, %v1204_v28  ;;  %v762_v27 = vpack.c.bf16 %v744_v34, %v742_v17  ;;  %v1203_v58 = vmul.f32 %v1199_v23, %v4607_v18  ;;  %v4612_v54 = vpack.c.bf16 %v4610_v55, %v4611_v62  ;;  %v4069_v28 = vld [vmem:[%s4465_s3] ss:$12 sps:$4 sm:$0xff]  }
 0x289   : > { %1482 = vmatprep.subr.bf16.mxu1 %v1118_v47  ;;  %v3998_v11 = vpop.permute.xlu0 %1268  ;;  %v658_v0 = vpop.permute.xlu1 %657  ;;  %v831_v47 = vsel %vm790_vm6, %v4609_v50, %v4608_v24  ;;  %v833_v26 = vsel %vm790_vm6, %v4608_v24, %v4609_v50 }
 0x28a   : > { %v660_v35 = vsel %vm602_vm1, %v3888_v8, %v658_v0  ;;  %v662_v31 = vsel %vm602_vm1, %v658_v0, %v3888_v8  ;;  %v4604_v8 = vpack.c.bf16 %v4602_v48, %v4603_v42  ;;  %v835_v23 = vmul.f32 %v833_v26, %v3800_v49 }
 0x28b   : > { %v665_v57 = vmul.f32 %v662_v31, %v3297_v46  ;;  %v666_v4 = vmul.f32 %v660_v35, %v3294_v45  ;;  %v4605_v46 = vld [vmem:[#allocation28_spill] sm:$0xff]  ;;  %v1211_v35 = vpack.c.bf16 %v1205_v22, %v1203_v58 }
 0x28c   : > { %1483 = vmatpush1.bf16.msra.mxu1 %v1117_v5  ;;  %v832_v45 = vsel %vm790_vm6, %v4606_v37, %v4605_v46  ;;  %v834_v34 = vsel %vm790_vm6, %v4605_v46, %v4606_v37  ;;  %v836_v5 = vmul.f32 %v831_v47, %v3777_v43 }
 0x28d   : > { %v671_v61 = vpack.c.bf16 %v665_v57, %v663_v59  ;;  %1484 = vmatprep.subr.bf16.mxu1 %v4604_v8  ;;  %v750_v1 = vpop.permute.xlu0 %749  ;;  %v4023_v33 = vpop.permute.xlu1 %1270  ;;  %v672_v6 = vpack.c.bf16 %v666_v4, %v664_v2  ;;  %v838_v17 = vmul.f32 %v832_v45, %v3777_v43  ;;  %v837_v4 = vmul.f32 %v834_v34, %v3800_v49  ;;  %v4613_v8 = vld [vmem:[#allocation32_spill] sm:$0xff] }
 0x28e   : > { %v753_v12 = vsel %vm696_vm5, %v3886_v14, %v750_v1  ;;  %v755_v13 = vsel %vm696_vm5, %v750_v1, %v3886_v14  ;;  %v4614_v1 = vld [vmem:[#allocation30_spill] sm:$0xff] }
 0x28f   : > { %1544 = vmatprep.subr.bf16.mxu0 %v672_v6  ;;  %v757_v31 = vmul.f32 %v755_v13, %v3738_v15  ;;  %v758_v59 = vmul.f32 %v753_v12, %v3717_v32  ;;  %v4616_v6 = vld [vmem:[#allocation31_spill] sm:$0xff]  ;;  %v856_v37 = vpack.c.bf16 %v838_v17, %v836_v5  ;;  %v855_v45 = vpack.c.bf16 %v837_v4, %v835_v23 }
 0x290   : > { %1485 = vmatpush1.bf16.msra.mxu1 %v4612_v54  ;;  %1545 = vmatpush1.bf16.msra.mxu0 %v671_v61  ;;  %v928_v24 = vsel %vm884_vm7, %v4613_v8, %v4614_v1  ;;  %v2293_v12 = vld [vmem:[%s4469_s7 + $0x7] ss:$8 sm:$0x3] }
 0x291   : > { %1486 = vmatprep.subr.bf16.mxu1 %v1212_v21  ;;  %v844_v0 = vpop.permute.xlu0 %843  ;;  %1546 = vmatprep.subr.bf16.mxu0 %v762_v27  ;;  %v752_v14 = vpop.permute.xlu1 %751  ;;  %v931_v26 = vmul.f32 %v928_v24, %v3850_v53  ;;  %v4119_v5 = vrot.slane %v2293_v12, %v3284_v40 }
 0x292   : > { %v754_v7 = vsel %vm696_vm5, %v3896_v44, %v752_v14  ;;  %v756_v29 = vsel %vm696_vm5, %v752_v14, %v3896_v44  ;;  %v847_v22 = vsel %vm790_vm6, %v3894_v63, %v844_v0  ;;  %v4116_v14 = vrot.slane %v2293_v12, %v3287_v41 }
 0x293   : > { %v759_v2 = vmul.f32 %v756_v29, %v3738_v15  ;;  %v760_v57 = vmul.f32 %v754_v7, %v3717_v32  ;;  %v926_v15 = vsel %vm884_vm7, %v4614_v1, %v4613_v8  ;;  %v4615_v32 = vld [vmem:[#allocation33_spill] sm:$0xff]  ;;  %v852_v54 = vmul.f32 %v847_v22, %v3777_v43 }
 0x294   : > { %1487 = vmatpush1.bf16.msra.mxu1 %v1211_v35  ;;  %1547 = vmatpush1.bf16.msra.mxu0 %v761_v38  ;;  %v925_v46 = vsel %vm884_vm7, %v4616_v6, %v4615_v32  ;;  %v849_v38 = vsel %vm790_vm6, %v844_v0, %v3894_v63  ;;  %v932_v50 = vmul.f32 %v926_v15, %v3829_v19  ;;  %v4617_v63 = vmov 0  }
 0x295   : > { %v765_v44 = vpack.c.bf16 %v759_v2, %v757_v31  ;;  %v938_v61 = vpop.permute.xlu0 %937  ;;  %v1275_v48 = vpop.permute.xlu1 %1274  ;;  %v766_v42 = vpack.c.bf16 %v760_v57, %v758_v59  ;;  %v927_v47 = vsel %vm884_vm7, %v4615_v32, %v4616_v6  ;;  %v930_v58 = vmul.f32 %v925_v46, %v3829_v19 }
 0x296   : > { %v851_v62 = vmul.f32 %v849_v38, %v3800_v49  ;;  %v929_v0 = vmul.f32 %v927_v47, %v3850_v53  ;;  %v1278_v31 = vsel %vm1276_vm8, %v4023_v33, %v1275_v48  ;;  %v1280_v59 = vsel %vm1276_vm8, %v1275_v48, %v4023_v33 }
 0x297   : > { %1548 = vmatprep.subr.bf16.mxu0 %v766_v42  ;;  %1489 = vmatmul.mubr.bf16.vlgmr.msra.gmra.mrb[0].mxu1 %v4069_v28  ;;  %v950_v2 = vpack.c.bf16 %v932_v50, %v930_v58 }
 0x298   : > { %1549 = vmatpush1.bf16.msra.mxu0 %v765_v44  ;;  %1531 = vmatprep.mubr.bf16.mxu1 %v4617_v63  ;;  %v949_v57 = vpack.c.bf16 %v931_v26, %v929_v0  ;;  %v1284_v44 = vmul.f32 %v1280_v59, %v4119_v5 }
 0x299   : > { %v4095_v21 = vpop.permute.xlu0 %1047  ;;  %1550 = vmatprep.subr.bf16.mxu0 %v856_v37  ;;  %v846_v27 = vpop.permute.xlu1 %845  ;;  %v2514_v37 = vld [vmem:[%s3113_s22 + $0x28] sm:$0xff] }
 0x29a   : > { %v848_v13 = vsel %vm790_vm6, %v3906_v25, %v846_v27  ;;  %v850_v55 = vsel %vm790_vm6, %v846_v27, %v3906_v25  ;;  %v2516_v27 = vld [vmem:[%s3113_s22 + $0x20] sm:$0xff]  ;;  %v1053_v26 = vsel %vm994_vm2, %v4095_v21, %v3927_v56 }
 0x29b   : > { %v853_v34 = vmul.f32 %v850_v55, %v3800_v49  ;;  %v854_v17 = vmul.f32 %v848_v13, %v3777_v43  ;;  %v941_v43 = vsel %vm884_vm7, %v3904_v20, %v938_v61  ;;  %v943_v49 = vsel %vm884_vm7, %v938_v61, %v3904_v20 }
 0x29c   : > { %1551 = vmatpush1.bf16.msra.mxu0 %v855_v45  ;;  %v945_v4 = vmul.f32 %v943_v49, %v3850_v53  ;;  %v946_v23 = vmul.f32 %v941_v43, %v3829_v19  ;;  %v1283_v20 = vmul.f32 %v1278_v31, %v4116_v14  ;;  %v4622_v43 = vld [vmem:[#allocation52_spill] sm:$0xff]  ;;  %v1056_v59 = vmul.f32 %v1053_v26, %v3378_v52 }
 0x29d   : > { %v859_v25 = vpack.c.bf16 %v853_v34, %v851_v62  ;;  %v4121_v7 = vpop.permute.xlu0 %1141  ;;  %v4123_v29 = vpop.permute.xlu1 %1217  ;;  %v860_v35 = vpack.c.bf16 %v854_v17, %v852_v54  ;;  %v4618_v62 = vld [vmem:[#allocation55_spill] sm:$0xff]  ;;  %v4619_v54 = vld [vmem:[#allocation53_spill] sm:$0xff]  ;;  %v1051_v17 = vsel %vm994_vm2, %v3927_v56, %v4095_v21 }
 0x29e   : > { %v4620_v34 = vpack.c.bf16 %v4618_v62, %v4619_v54  ;;  %v1055_v31 = vmul.f32 %v1051_v17, %v3375_v51  ;;  %v4624_v21 = vld [vmem:[#allocation39_spill] sm:$0xff]  ;;  %v4630_v62 = vld [vmem:[#allocation49_spill] sm:$0xff] }
 0x29f   : > { %1552 = vmatprep.subr.bf16.mxu0 %v860_v35  ;;  %v4621_v35 = vld [vmem:[#allocation54_spill] sm:$0xff]  ;;  %v1628_v54 = vld [vmem:[#allocation12] sm:$0xff] }
 0x2a0   : > { %1553 = vmatpush1.bf16.msra.mxu0 %v859_v25  ;;  %v4623_v49 = vpack.c.bf16 %v4621_v35, %v4622_v43 }
 0x2a1   : > { %v1273_v61 = vpop.permute.xlu0 %1272  ;;  %1554 = vmatprep.subr.bf16.mxu0 %v950_v2  ;;  %v940_v42 = vpop.permute.xlu1 %939 }
 0x2a2   : > { %v1277_v33 = vsel %vm1276_vm8, %v3998_v11, %v1273_v61  ;;  %v1279_v48 = vsel %vm1276_vm8, %v1273_v61, %v3998_v11  ;;  %v942_v8 = vsel %vm884_vm7, %v3929_v30, %v940_v42  ;;  %v944_v1 = vsel %vm884_vm7, %v940_v42, %v3929_v30  ;;  %v2513_v11 = vld [vmem:[%s3113_s22 + $0x38] sm:$0xff]  ;;  %v1633_v61 = vld [vmem:[#allocation12 + $0x28] sm:$0xff] }
 0x2a3   : > { %v1281_v15 = vmul.f32 %v1277_v33, %v4116_v14  ;;  %v1282_v32 = vmul.f32 %v1279_v48, %v4119_v5  ;;  %v947_v6 = vmul.f32 %v944_v1, %v3850_v53  ;;  %v948_v46 = vmul.f32 %v942_v8, %v3829_v19  ;;  %v2515_v53 = vld [vmem:[%s3113_s22 + $0x30] sm:$0xff] }
 0x2a4   : > { %1555 = vmatpush1.bf16.msra.mxu0 %v949_v57  ;;  %v966_v45 = vpack.c.bf16 %v2513_v11, %v2514_v37  ;;  %v965_v19 = vpack.c.bf16 %v2515_v53, %v2516_v27  ;;  %v4628_v11 = vld [vmem:[#allocation40_spill] sm:$0xff]  ;;  %v1145_v27 = vsel %vm1088_vm3, %v3939_v60, %v4121_v7 }
 0x2a5   : > { %v1301_v22 = vpack.c.bf16 %v1283_v20, %v1281_v15  ;;  %v953_v38 = vpack.c.bf16 %v947_v6, %v945_v4  ;;  %v4159_v24 = vpop.permute.xlu0 %1215  ;;  %v4161_v50 = vpop.permute.xlu1 %1221  ;;  %v1302_v30 = vpack.c.bf16 %v1284_v44, %v1282_v32  ;;  %v954_v47 = vpack.c.bf16 %v948_v46, %v946_v23  ;;  %v4625_v23 = vld [vmem:[#allocation41_spill] sm:$0xff]  ;;  %v1629_v44 = vld [vmem:[#allocation12 + $0x8] sm:$0xff]  ;;  %v4627_v46 = vld [vmem:[#allocation38_spill] sm:$0xff] }
 0x2a6   : > { %v4626_v20 = vpack.c.bf16 %v4624_v21, %v4625_v23  ;;  %v4629_v37 = vpack.c.bf16 %v4627_v46, %v4628_v11  ;;  %v1226_v26 = vsel %vm1182_vm4, %v4161_v50, %v4123_v29 }
 0x2a7   : > { %1499 = vmatprep.subr.bf16.mxu1 %v1302_v30  ;;  %1556 = vmatprep.subr.bf16.mxu0 %v954_v47 }
 0x2a8   : > { %1500 = vmatpush1.bf16.msra.mxu1 %v1301_v22  ;;  %1557 = vmatpush1.bf16.msra.mxu0 %v953_v38 }
 0x2a9   : > { %v1220_v58 = vpop.permute.xlu0 %1219  ;;  %v1288_v12 = vpop.permute.xlu1 %1287  ;;  %1558 = vmatprep.subr.bf16.mxu0 %v966_v45  ;;  %v4207_v45 = vpack.c.bf16 %v1633_v61, %v1629_v44 }
 0x2aa   : > { %v1223_v35 = vsel %vm1182_vm4, %v4159_v24, %v1220_v58 }
 0x2ac   : > { %1559 = vmatpush1.bf16.msra.mxu0 %v965_v19  ;;  %v1225_v19 = vsel %vm1182_vm4, %v1220_v58, %v4159_v24  ;;  %v1224_v24 = vsel %vm1182_vm4, %v4123_v29, %v4161_v50 }
 0x2ad   : > { %v1286_v13 = vpop.permute.xlu0 %1285  ;;  %v1292_v55 = vpop.permute.xlu1 %1291  ;;  %1560 = vmatprep.subr.bf16.mxu0 %v4620_v34  ;;  %v1632_v34 = vld [vmem:[#allocation12 + $0x20] sm:$0xff]  ;;  %v1228_v43 = vmul.f32 %v1225_v19, %v4601_v16 }
 0x2ae   : > { %v1294_v0 = vsel %vm1276_vm8, %v1288_v12, %v1292_v55  ;;  %v1296_v25 = vsel %vm1276_vm8, %v1292_v55, %v1288_v12  ;;  %v1149_v12 = vmul.f32 %v1145_v27, %v3409_v9 }
 0x2af   : > { %v1299_v2 = vmul.f32 %v1294_v0, %v4116_v14  ;;  %v1300_v57 = vmul.f32 %v1296_v25, %v4119_v5 }
 0x2b0   : > { %1561 = vmatpush1.bf16.msra.mxu0 %v4623_v49 }
 0x2b1   : > { %v1290_v4 = vpop.permute.xlu0 %1289  ;;  %v1050_v56 = vpop.permute.xlu1 %1049  ;;  %1562 = vmatprep.subr.bf16.mxu0 %v4626_v20  ;;  %v1227_v20 = vmul.f32 %v1223_v35, %v4607_v18 }
 0x2b2   : > { %v1293_v42 = vsel %vm1276_vm8, %v1286_v13, %v1290_v4  ;;  %v1295_v33 = vsel %vm1276_vm8, %v1290_v4, %v1286_v13  ;;  %v1052_v48 = vsel %vm994_vm2, %v3941_v3, %v1050_v56  ;;  %v1054_v8 = vsel %vm994_vm2, %v1050_v56, %v3941_v3  ;;  %v4634_v4 = vld [vmem:[#allocation50_spill] sm:$0xff] }
 0x2b3   : > { %v1297_v1 = vmul.f32 %v1293_v42, %v4116_v14  ;;  %v1298_v15 = vmul.f32 %v1295_v33, %v4119_v5  ;;  %v1057_v32 = vmul.f32 %v1052_v48, %v3375_v51  ;;  %v1058_v6 = vmul.f32 %v1054_v8, %v3378_v52  ;;  %v4220_v52 = vld [vmem:[%s4465_s3 + $0x8] ss:$12 sps:$4 sm:$0xff]  }
 0x2b4   : > { %1563 = vmatpush1.bf16.msra.mxu0 %v4629_v37  ;;  %v1147_v51 = vsel %vm1088_vm3, %v4121_v7, %v3939_v60  ;;  %v4631_v60 = vld [vmem:[#allocation51_spill] sm:$0xff]  ;;  %v1229_v42 = vmul.f32 %v1224_v24, %v4607_v18  ;;  %v1639_v24 = vld [vmem:[#allocation12 + $0x58] sm:$0xff] }
 0x2b5   : > { %v1305_v22 = vpack.c.bf16 %v1299_v2, %v1297_v1  ;;  %v1063_v38 = vpack.c.bf16 %v1057_v32, %v1055_v31  ;;  %v1232_v30 = vpop.permute.xlu0 %1231  ;;  %v1234_v47 = vpop.permute.xlu1 %1233  ;;  %v1306_v53 = vpack.c.bf16 %v1300_v57, %v1298_v15  ;;  %v1064_v3 = vpack.c.bf16 %v1058_v6, %v1056_v59  ;;  %v1637_v59 = vld [vmem:[#allocation12 + $0x48] sm:$0xff]  ;;  %v1636_v32 = vld [vmem:[#allocation12 + $0x40] sm:$0xff] }
 0x2b6   : > { %v4632_v7 = vpack.c.bf16 %v4630_v62, %v4631_v60  ;;  %v1150_v17 = vmul.f32 %v1147_v51, %v3412_v10  ;;  %v1641_v2 = vld [vmem:[#allocation12 + $0x68] sm:$0xff]  ;;  %v1247_v8 = vpack.c.bf16 %v1229_v42, %v1227_v20  ;;  %v1640_v6 = vld [vmem:[#allocation12 + $0x60] sm:$0xff] }
 0x2b7   : > { %1501 = vmatprep.subr.bf16.mxu1 %v1306_v53  ;;  %1564 = vmatprep.subr.bf16.mxu0 %v1064_v3  ;;  %v4633_v57 = vld [vmem:[#allocation48_spill] sm:$0xff]  ;;  %v4260_v44 = vpack.c.bf16 %v1641_v2, %v1637_v59  ;;  %v4281_v51 = vpack.c.bf16 %v1640_v6, %v1636_v32  ;;  %v1635_v59 = vld [vmem:[#allocation12 + $0x38] sm:$0xff] }
 0x2b8   : > { %1502 = vmatpush1.bf16.msra.mxu1 %v1305_v22  ;;  %1565 = vmatpush1.bf16.msra.mxu0 %v1063_v38  ;;  %v4635_v56 = vpack.c.bf16 %v4633_v57, %v4634_v4  ;;  %v1630_v57 = vld [vmem:[#allocation12 + $0x10] sm:$0xff] }
 0x2b9   : > { %v1236_v13 = vpop.permute.xlu0 %1235  ;;  %v1144_v55 = vpop.permute.xlu1 %1143  ;;  %1566 = vmatprep.subr.bf16.mxu0 %v4632_v7  ;;  %2335 = vmatprep.subr.bf16.mxu1 %v4207_v45  ;;  %v1634_v4 = vld [vmem:[#allocation12 + $0x30] sm:$0xff] }
 0x2ba   : > { %v1146_v0 = vsel %vm1088_vm3, %v3968_v36, %v1144_v55  ;;  %v1148_v25 = vsel %vm1088_vm3, %v1144_v55, %v3968_v36  ;;  %v4252_v36 = vpack.c.bf16 %v1632_v34, %v1628_v54  ;;  %v1239_v33 = vsel %vm1182_vm4, %v1232_v30, %v1236_v13 }
 0x2bb   : > { %v1151_v49 = vmul.f32 %v1146_v0, %v3409_v9  ;;  %v1152_v31 = vmul.f32 %v1148_v25, %v3412_v10  ;;  %2297 = vmatmul.mubr.msk.bf16.vlgmr.msra.gmra.mrb[0].mxu1 %vm1452_vm9, %v4220_v52  ;;  %v1230_v9 = vmul.f32 %v1226_v26, %v4601_v16  ;;  %v1241_v29 = vsel %vm1182_vm4, %v1236_v13, %v1232_v30 }
 0x2bc   : > { %1567 = vmatpush1.bf16.msra.mxu0 %v4635_v56  ;;  %v1243_v46 = vmul.f32 %v1239_v33, %v4607_v18  ;;  %v1244_v11 = vmul.f32 %v1241_v29, %v4601_v16 }
 0x2bd   : > { %v1157_v58 = vpack.c.bf16 %v1151_v49, %v1149_v12  ;;  %v1310_v10 = vpop.permute.xlu0 %1309  ;;  %v1312_v21 = vpop.permute.xlu1 %1311  ;;  %v1158_v23 = vpack.c.bf16 %v1152_v31, %v1150_v17  ;;  %v1248_v61 = vpack.c.bf16 %v1230_v9, %v1228_v43  ;;  %v1643_v9 = vld [vmem:[#allocation12 + $0x78] sm:$0xff] }
 0x2be   : > { %v4319_v42 = vpack.c.bf16 %v1643_v9, %v1639_v24 }
 0x2bf   : > { %1568 = vmatprep.subr.bf16.mxu0 %v1158_v23  ;;  %v4315_v23 = vpack.c.bf16 %v1634_v4, %v1630_v57  ;;  %v2074_v4 = vld [vmem:[#allocation11] sm:$0xf] }
 0x2c0   : > { %1569 = vmatpush1.bf16.msra.mxu0 %v1157_v58 }
 0x2c1   : > { %v1314_v50 = vpop.permute.xlu0 %1313  ;;  %v1238_v48 = vpop.permute.xlu1 %1237  ;;  %1570 = vmatprep.subr.bf16.mxu0 %v1248_v61  ;;  %2337 = vmatpush1.bf16.xpose.msra.mxu1 %v4252_v36 }
 0x2c2   : > { %v1240_v1 = vsel %vm1182_vm4, %v1234_v47, %v1238_v48  ;;  %v1242_v15 = vsel %vm1182_vm4, %v1238_v48, %v1234_v47  ;;  %2339 = vmatprep.subr.bf16.mxu1 %v4260_v44  ;;  %v1317_v38 = vsel %vm1276_vm8, %v1310_v10, %v1314_v50  ;;  %v1319_v30 = vsel %vm1276_vm8, %v1314_v50, %v1310_v10  ;;  %v1638_v50 = vld [vmem:[#allocation12 + $0x50] sm:$0xff] }
 0x2c3   : > { %v1245_v37 = vmul.f32 %v1240_v1, %v4607_v18  ;;  %v1246_v22 = vmul.f32 %v1242_v15, %v4601_v16  ;;  %v1321_v16 = vmul.f32 %v1317_v38, %v4116_v14  ;;  %v1322_v12 = vmul.f32 %v1319_v30, %v4119_v5  ;;  %v1642_v48 = vld [vmem:[#allocation12 + $0x70] sm:$0xff] }
 0x2c4   : > { %1571 = vmatpush1.bf16.msra.mxu0 %v1247_v8  ;;  %v4333_v1 = vpack.c.bf16 %v1642_v48, %v1638_v50  ;;  %v2083_v50 = vrot.slane %v2074_v4, %v3284_v40 }
 0x2c5   : > { %v1251_v47 = vpack.c.bf16 %v1245_v37, %v1243_v46  ;;  %v1326_v53 = vpop.permute.xlu0 %1325  ;;  %v1316_v3 = vpop.permute.xlu1 %1315  ;;  %v1252_v27 = vpack.c.bf16 %v1246_v22, %v1244_v11 }
 0x2c6   : > { %v1318_v19 = vsel %vm1276_vm8, %v1312_v21, %v1316_v3  ;;  %v1320_v18 = vsel %vm1276_vm8, %v1316_v3, %v1312_v21 }
 0x2c7   : > { %v1323_v13 = vmul.f32 %v1318_v19, %v4116_v14  ;;  %v1324_v55 = vmul.f32 %v1320_v18, %v4119_v5  ;;  %1572 = vmatprep.subr.bf16.mxu0 %v1252_v27 }
 0x2c8   : > { %1573 = vmatpush1.bf16.msra.mxu0 %v1251_v47 }
 0x2c9   : > { %v1341_v62 = vpack.c.bf16 %v1323_v13, %v1321_v16  ;;  %v1342_v60 = vpack.c.bf16 %v1324_v55, %v1322_v12  ;;  %2341 = vmatpush1.bf16.xpose.msra.mxu1 %v4281_v51  ;;  %v1330_v7 = vpop.permute.xlu0 %1329  ;;  %v1328_v54 = vpop.permute.xlu1 %1327 }
 0x2ca   : > { %v1333_v34 = vsel %vm1276_vm8, %v1326_v53, %v1330_v7  ;;  %v1335_v17 = vsel %vm1276_vm8, %v1330_v7, %v1326_v53 }
 0x2cb   : > { %1575 = vmatmul.mubr.bf16.vlgmr.msra.gmra.mrb[8].mxu0 %v4069_v28  ;;  %1585 = vmatprep.subr.bf16.mxu0 %v1342_v60  ;;  %v1337_v35 = vmul.f32 %v1333_v34, %v4116_v14  ;;  %v1338_v28 = vmul.f32 %v1335_v17, %v4119_v5 }
 0x2cc   : > { %1586 = vmatpush1.bf16.msra.mxu0 %v1341_v62  ;;  %1617 = vmatprep.mubr.bf16.mxu0 %v4617_v63 }
 0x2cd   : > { %v1332_v26 = vpop.permute.xlu1 %1331 }
 0x2ce   : > { %v1334_v0 = vsel %vm1276_vm8, %v1328_v54, %v1332_v26  ;;  %v1336_v25 = vsel %vm1276_vm8, %v1332_v26, %v1328_v54 }
 0x2cf   : > { %v1339_v43 = vmul.f32 %v1334_v0, %v4116_v14  ;;  %v1340_v63 = vmul.f32 %v1336_v25, %v4119_v5  ;;  %v1631_v14 = vld [vmem:[#allocation12 + $0x18] sm:$0xff] }
 0x2d0   : > { %v2342_v5 = vpack.c.bf16 %v1635_v59, %v1631_v14 }
 0x2d1   : > { %v1345_v49 = vpack.c.bf16 %v1339_v43, %v1337_v35  ;;  %v1346_v31 = vpack.c.bf16 %v1340_v63, %v1338_v28 }
 0x2d2   : > { %2343 = vmatprep.subr.bf16.mxu1 %v2342_v5 }
 0x2d3   : > { %1587 = vmatprep.subr.bf16.mxu0 %v1346_v31 }
 0x2d4   : > { %1588 = vmatpush1.bf16.msra.mxu0 %v1345_v49 }
 0x2d5   : > { %2351 = vmatprep.subr.bf16.mxu0 %v4207_v45 }
 0x2d7   : > { %2298 = vmatmul.mubr.msk.bf16.vlgmr.msra.gmra.mrb[8].mxu0 %vm1452_vm9, %v4220_v52 }
 0x2d8   : > { %2353 = vmatpush1.bf16.msra.mxu0 %v4252_v36  ;;  %1914 = vmatprep.mubr.f32.mxu0 %v4636_v39 }
 0x2d9   : > { %2355 = vmatprep.subr.bf16.mxu0 %v4260_v44 }
 0x2db   : > { %v1430_v2 = vpop.permute.xlu0 %1429 }
 0x2dc   : > { %2357 = vmatpush1.bf16.msra.mxu0 %v4281_v51 }
 0x2dd   : > { %2359 = vmatprep.subr.bf16.mxu0 %v2342_v5  ;;  %v2044_v5 = vld [vmem:[#allocation9] sm:$0xf] }
 0x2de   : > { %v1435_v58 = vpop.permute.xlu1 %1434  ;;  %v2049_v9 = vrot.slane %v2044_v5, %v3287_v41 }
 0x38e   : > { %v1533_v56 = vpop.f32.mrb[0].mxu1 }
 0x38f   : > { %v1535_v52 = vpop.f32.mrb[1].mxu1  ;;  %v4317_v20 = vadd.f32 %v1533_v56, %v1430_v2 }
 0x390   : > { %v4313_v10 = vadd.f32 %v1535_v52, %v1430_v2  ;;  %v1537_v21 = vpop.f32.mrb[2].mxu1 }
 0x391   : > { %v1539_v61 = vpop.f32.mrb[3].mxu1  ;;  %v4327_v29 = vadd.f32 %v1537_v21, %v1435_v58  ;;  %v1644_v15 = vmul.f32 %v4317_v20, %v4317_v20  ;;  %v2053_v21 = vrot.slane %v2044_v5, %v3284_v40 }
 0x392   : > { %v4321_v33 = vadd.f32 %v1539_v61, %v1435_v58  ;;  %1716 = vmatprep.mubr.f32.mxu1 %v4313_v10  ;;  %v1645_v8 = vmul.f32 %v4313_v10, %v4313_v10 }
 0x393   : > { %1717 = vmatmul.mubr.f32.vlgmr.msra.gmra.mrb[4].mxu1 %v4317_v20  ;;  %v1648_v6 = vmul.f32 %v4327_v29, %v4327_v29 }
 0x394   : > { %1721 = vmatprep.mubr.f32.mxu1 %v4321_v33  ;;  %2345 = vmatpush1.bf16.xpose.msra.mxu1 %v4315_v23  ;;  %v1649_v32 = vmul.f32 %v4321_v33, %v4321_v33 }
 0x395   : > { %2347 = vmatprep.subr.bf16.mxu1 %v4319_v42 }
 0x397   : > { %1722 = vmatmul.mubr.f32.gmra.mrb[6].mxu1 %v4327_v29 }
 0x398   : > { %1726 = vmatprep.mubr.f32.mxu1 %v1645_v8 }
 0x39b   : > { %1727 = vmatmul.mubr.f32.gmra.mrb[8].mxu1 %v1644_v15 }
 0x39c   : > { %1731 = vmatprep.mubr.f32.mxu1 %v1649_v32  ;;  %2349 = vmatpush1.bf16.xpose.msra.mxu1 %v4333_v1 }
 0x39d   : > { %2366 = vmatprep.subr.bf16.mxu1 %v4207_v45 }
 0x39f   : > { %1732 = vmatmul.mubr.f32.gmra.mrb[10].mxu1 %v1648_v6 }
 0x3aa   : > { %v1619_v46 = vpop.f32.mrb[8].mxu0 }
 0x3ab   : > { %v1621_v11 = vpop.f32.mrb[9].mxu0  ;;  %v4345_v38 = vadd.f32 %v1619_v46, %v1430_v2 }
 0x3ac   : > { %v4343_v37 = vadd.f32 %v1621_v11, %v1430_v2  ;;  %v1623_v22 = vpop.f32.mrb[10].mxu0 }
 0x3ad   : > { %v1625_v30 = vpop.f32.mrb[11].mxu0  ;;  %v4353_v45 = vadd.f32 %v1623_v22, %v1435_v58  ;;  %v1646_v3 = vmul.f32 %v4345_v38, %v4345_v38 }
 0x3ae   : > { %v4347_v47 = vadd.f32 %v1625_v30, %v1435_v58  ;;  %1801 = vmatprep.mubr.f32.mxu1 %v4343_v37  ;;  %v1647_v53 = vmul.f32 %v4343_v37, %v4343_v37 }
 0x3af   : > { %1802 = vmatmul.mubr.f32.vlgmr.msra.gmra.mrb[4].mxu1 %v4345_v38 }
 0x3b0   : > { %1806 = vmatprep.mubr.f32.mxu1 %v4347_v47  ;;  %2368 = vmatpush1.bf16.msra.mxu1 %v4252_v36  ;;  %v1651_v27 = vmul.f32 %v4347_v47, %v4347_v47  ;;  %v1650_v36 = vmul.f32 %v4353_v45, %v4353_v45 }
 0x3b1   : > { %2367 = vmatprep.subr.bf16.mxu1 %v4260_v44 }
 0x3b3   : > { %1807 = vmatmul.mubr.f32.gmra.mrb[6].mxu1 %v4353_v45 }
 0x3b4   : > { %1811 = vmatprep.mubr.f32.mxu1 %v1647_v53  ;;  %2369 = vmatpush1.bf16.msra.mxu1 %v4281_v51 }
 0x3b7   : > { %1812 = vmatmul.mubr.f32.gmra.mrb[8].mxu1 %v1646_v3 }
 0x3b8   : > { %1816 = vmatprep.mubr.f32.mxu1 %v1651_v27  ;;  %v4637_v27 = vld [vmem:[#allocation23_spill] sm:$0xff] }
 0x3bb   : > { %1817 = vmatmul.mubr.f32.gmra.mrb[10].mxu1 %v1650_v36  ;;  %v2056_v36 = vsub.s32 2, %v4637_v27 }
 0x3bc   : > { %1932 = vmatprep.mubr.f32.mxu1 %v4636_v39 }
 0x482   : > { %v1803_v44 = vpop.f32.mrb[4].mxu1 }
 0x483   : > { %v1805_v19 = vpop.f32.mrb[5].mxu1  ;;  %v1822_v16 = vmul.f32 0.0625, %v1803_v44  ;;  %v2060_v44 = vsub.s32 3, %v4637_v27 }
 0x485   : > { %v1826_v13 = vmul.f32 %v1822_v16, %v1822_v16  ;;  %v1834_v28 = vsub.f32 0.0, %v1822_v16  ;;  %v2057_v16 = vrot.slane %v2044_v5, %v2056_v36 }
 0x486   : > { %v1808_v18 = vpop.f32.mrb[6].mxu1 }
 0x487   : > { %v1810_v12 = vpop.f32.mrb[7].mxu1  ;;  %v1823_v55 = vmul.f32 0.0625, %v1808_v18 }
 0x489   : > { %v1827_v34 = vmul.f32 %v1823_v55, %v1823_v55  ;;  %v1835_v49 = vsub.f32 0.0, %v1823_v55 }
 0x48a   : > { %v1813_v51 = vpop.f32.mrb[8].mxu1 }
 0x48b   : > { %v1824_v62 = vmul.f32 0.0625, %v1813_v51  ;;  %v1815_v60 = vpop.f32.mrb[9].mxu1 }
 0x48d   : > { %v1828_v7 = vsub.f32 %v1824_v62, %v1826_v13  ;;  %v2061_v13 = vrot.slane %v2044_v5, %v2060_v44  ;;  %v2087_v62 = vrot.slane %v2074_v4, %v2056_v36 }
 0x48e   : > { %v1818_v54 = vpop.f32.mrb[10].mxu1 }
 0x48f   : > { %v1830_v17 = vadd.f32 1e-05, %v1828_v7  ;;  %v1825_v26 = vmul.f32 0.0625, %v1818_v54  ;;  %v1820_v0 = vpop.f32.mrb[11].mxu1  ;;  %v2091_v7 = vrot.slane %v2074_v4, %v2060_v44 }
 0x491   : > { %2509 = vrsqrt.f32 %v1830_v17  ;;  %v1829_v25 = vsub.f32 %v1825_v26, %v1827_v34 }
 0x493   : > { %v1831_v35 = vadd.f32 1e-05, %v1829_v25 }
 0x495   : > { %2511 = vrsqrt.f32 %v1831_v35 }
 0x49b   : > { %v2510_v43 = vpop.eup %2509 }
 0x49c   : > { %v1836_v63 = vmul.f32 %v2510_v43, %v1834_v28 }
 0x49e   : > { %2299 = vmatmul.mubr.msk.f32.vlgmr.msra.gmra.mrb[12].mxu0 %vm1452_vm9, %v1836_v63 }
 0x49f   : > { %v2512_v31 = vpop.eup %2511  ;;  %1920 = vmatprep.mubr.f32.mxu0 %v4636_v39  ;;  %2361 = vmatpush1.bf16.msra.mxu0 %v4315_v23 }
 0x4a0   : > { %2302 = vmatmul.mubr.msk.f32.vlgmr.msra.gmra.mrb[12].mxu1 %vm1452_vm9, %v2512_v31  ;;  %v1837_v14 = vmul.f32 %v2512_v31, %v1835_v49  ;;  %2363 = vmatprep.subr.bf16.mxu0 %v4319_v42 }
 0x4a2   : > { %2300 = vmatmul.mubr.msk.f32.gmra.mrb[14].mxu0 %vm1452_vm9, %v1837_v14 }
 0x4a3   : > { %1926 = vmatprep.mubr.f32.mxu0 %v4636_v39  ;;  %2365 = vmatpush1.bf16.msra.mxu0 %v4333_v1 }
 0x4a6   : > { %2301 = vmatmul.mubr.msk.f32.gmra.mrb[16].mxu0 %vm1452_vm9, %v2510_v43 }
 0x4a7   : > { %2003 = vmatprep.mubr.f32.mxu0 %v4636_v39 }
 0x4aa   : > { %2303 = vmatmul.mubr.msk.f32.vlgmr.msra.gmra.mrb[18].mxu0 %vm1452_vm9, %v1836_v63 }
 0x4ab   : > { %2009 = vmatprep.mubr.f32.mxu0 %v4636_v39 }
 0x4ae   : > { %2304 = vmatmul.mubr.msk.f32.gmra.mrb[20].mxu0 %vm1452_vm9, %v1837_v14 }
 0x4af   : > { %2015 = vmatprep.mubr.f32.mxu0 %v4636_v39 }
 0x4b2   : > { %2305 = vmatmul.mubr.msk.f32.gmra.mrb[22].mxu0 %vm1452_vm9, %v2510_v43 }
 0x4b3   : > { %2021 = vmatprep.mubr.f32.mxu0 %v4636_v39  ;;  %v2079_v39 = vrot.slane %v2074_v4, %v3287_v41 }
 0x4b6   : > { %2306 = vmatmul.mubr.msk.f32.gmra.mrb[24].mxu0 %vm1452_vm9, %v2512_v31 }
 0x571   : > { %v1916_v59 = vpop.f32.mrb[12].mxu0 }
 0x572   : > { %v1918_v2 = vpop.f32.mrb[13].mxu0 }
 0x573   : > { %v1934_v57 = vpop.f32.mrb[12].mxu1 }
 0x574   : > { %v2032_v56 = vmul.f32 %v4327_v29, %v1934_v57  ;;  %v1936_v24 = vpop.f32.mrb[13].mxu1 }
 0x575   : > { %v2033_v52 = vmul.f32 %v4321_v33, %v1936_v24  ;;  %v1922_v58 = vpop.f32.mrb[14].mxu0 }
 0x576   : > { %v2040_v23 = vadd.f32 %v2032_v56, %v1922_v58  ;;  %v1924_v61 = vpop.f32.mrb[15].mxu0 }
 0x577   : > { %v2041_v42 = vadd.f32 %v2033_v52, %v1924_v61 }
 0x578   : > { %v2070_v48 = vmul.f32 %v2049_v9, %v2040_v23 }
 0x579   : > { %v2071_v8 = vmul.f32 %v2053_v21, %v2041_v42  ;;  %v1928_v1 = vpop.f32.mrb[16].mxu0 }
 0x57a   : > { %v2100_v29 = vadd.f32 %v2079_v39, %v2070_v48  ;;  %v2028_v15 = vmul.f32 %v4317_v20, %v1928_v1  ;;  %v1930_v32 = vpop.f32.mrb[17].mxu0 }
 0x57b   : > { %v2101_v6 = vadd.f32 %v2083_v50, %v2071_v8  ;;  %v2029_v33 = vmul.f32 %v4313_v10, %v1930_v32 }
 0x57c   : > { %2106 = vst [vmem:[%s4394_s20 + $0x10] sm:$0xff] %v2100_v29  ;;  %v2036_v41 = vadd.f32 %v2028_v15, %v1916_v59 }
 0x57d   : > { %2107 = vst [vmem:[%s4394_s20 + $0x18] sm:$0xff] %v2101_v6  ;;  %v2037_v40 = vadd.f32 %v2029_v33, %v1918_v2  ;;  %v2005_v46 = vpop.f32.mrb[18].mxu0 }
 0x57e   : > { %v2066_v11 = vmul.f32 %v2049_v9, %v2036_v41  ;;  %v2007_v22 = vpop.f32.mrb[19].mxu0 }
 0x57f   : > { %v2067_v30 = vmul.f32 %v2053_v21, %v2037_v40 }
 0x580   : > { %v2096_v20 = vadd.f32 %v2079_v39, %v2066_v11 }
 0x581   : > { %v2097_v53 = vadd.f32 %v2083_v50, %v2067_v30  ;;  %v2011_v3 = vpop.f32.mrb[20].mxu0 }
 0x582   : > { %2104 = vst [vmem:[%s4394_s20] sm:$0xff] %v2096_v20  ;;  %v2013_v10 = vpop.f32.mrb[21].mxu0 }
 0x583   : > { %2105 = vst [vmem:[%s4394_s20 + $0x8] sm:$0xff] %v2097_v53 }
 0x585   : > { %v2017_v19 = vpop.f32.mrb[22].mxu0 }
 0x586   : > { %v2030_v18 = vmul.f32 %v4345_v38, %v2017_v19  ;;  %v2019_v12 = vpop.f32.mrb[23].mxu0 }
 0x587   : > { %v2031_v51 = vmul.f32 %v4343_v37, %v2019_v12 }
 0x588   : > { %v2038_v55 = vadd.f32 %v2030_v18, %v2005_v46 }
 0x589   : > { %v2039_v60 = vadd.f32 %v2031_v51, %v2007_v22  ;;  %v2023_v54 = vpop.f32.mrb[24].mxu0 }
 0x58a   : > { %v2068_v34 = vmul.f32 %v2057_v16, %v2038_v55  ;;  %v2034_v17 = vmul.f32 %v4353_v45, %v2023_v54  ;;  %v2025_v26 = vpop.f32.mrb[25].mxu0 }
 0x58b   : > { %v2069_v0 = vmul.f32 %v2061_v13, %v2039_v60  ;;  %v2035_v38 = vmul.f32 %v4347_v47, %v2025_v26 }
 0x58c   : > { %v2098_v37 = vadd.f32 %v2087_v62, %v2068_v34  ;;  %v2042_v25 = vadd.f32 %v2034_v17, %v2011_v3 }
 0x58d   : > { %v2099_v35 = vadd.f32 %v2091_v7, %v2069_v0  ;;  %v2043_v28 = vadd.f32 %v2035_v38, %v2013_v10 }
 0x58e   : > { %2108 = vst [vmem:[%s4394_s20 + $0x20] sm:$0xff] %v2098_v37  ;;  %v2072_v43 = vmul.f32 %v2057_v16, %v2042_v25 }
 0x58f   : > { %2109 = vst [vmem:[%s4394_s20 + $0x28] sm:$0xff] %v2099_v35  ;;  %v2073_v63 = vmul.f32 %v2061_v13, %v2043_v28 }
 0x590   : > { %v2102_v49 = vadd.f32 %v2087_v62, %v2072_v43 }
 0x591   : > { %v2103_v47 = vadd.f32 %v2091_v7, %v2073_v63 }
 0x592   : > { %2110 = vst [vmem:[%s4394_s20 + $0x30] sm:$0xff] %v2102_v49 }
 0x593   : > { %2111 = vst [vmem:[%s4394_s20 + $0x38] sm:$0xff] %v2103_v47 }
 0x594   : > { %2702 = shalt.err (!%p2699_p4)
}
 0x595   : > { %s2703_s5 = scalar_lea.hbm %s4413_s14, 1024  ;;  %s2707_s24 = scalar_lea.hbm %s4638_s29, 2048 }
 0x596   : > { %p2704_p11 = scmp.ne.s32.totalorder %s4413_s14, %s2703_s5  ;;  %p2708_p1 = scmp.lt.u32.totalorder %s4413_s14, %s4638_s29 }
 0x597   : > { %p2709_p2 = scmp.lt.u32.totalorder %s2707_s24, %s2703_s5  ;;  %p2711_p0 = scmp.lt.u32.totalorder %s2703_s5, %s4413_s14 }
 0x598   : > { %p2705_p7 = pnand %p2704_p11, %p3012_p3 }
 0x599   : > { %p2710_p13 = por %p2709_p2, %p2708_p1 }
 0x59a   : > { %p2706_p12 = pneg %p2705_p7 }
 0x59b   : > { %p2712_p6 = por %p2711_p0, %p2710_p13 }
 0x59d   : > { %p2713_p8 = pnand %p2712_p6, %p2706_p12 }
 0x59f   : > { %2716 = shalt.err (!%p2713_p8)
}
 0x5a0   : > { %s2796_s20 = smov 256  }
 0x5a1   : > { %2414 = dma.vmem_to_hbm [thread:$0]  (%p3012_p3), %s4415_s9, 1024, %s4413_s14, %s2113_s13, %s2796_s20, %s2796_s20, %s2787_s23  }
 0x5a2 PF: > { %s4639_s26 = sld [smem:[#allocation21_spill]]  ;;  %s4640_s19 = sld [smem:[#allocation22_spill]] }
 0x5a3   : > { %p4642_p5 = scmp.ge.s32.totalorder %s2771_s12, 2 }
 0x5a8   : > { %s2142_s2 = sand.u32 1, %s4639_s26   ;;  %p4641_p10 = scmp.ne.s32.totalorder %s4640_s19, 0 }
 0x5a9   : > { %s2143_s6 = scalar_lea.sflag [#allocation5], %s2142_s2 }
 0x5aa   : > { %p2437_p9 = pnand %p4642_p5, %p4641_p10 }
 0x5ac   : > { %2754 = dma.done.wait (!%p2437_p9), %s2143_s6, 1024  }
 0x5ad   : > { %2756 = vsyncadd (!%p2437_p9), %s2143_s6, 4294966272  ;;  %p27_p4 = scmp.ge.s32.totalorder %s2999_s27, 4   ;;  %s4643_s30 = smov %s2763_s10 }
 0x5ae   : > { %s4644_s10 = smov %s2767_s11  ;;  %s4645_s11 = smov %s3008_s18 }
 0x5af   : > { %s4646_s12 = smov %s2999_s27  ;;  %29 = sbr.rel (!%p27_p4) target bundleno = 15 (0xf), region = 137 }
 0x5b6   :  { %2148 = vsyncpa [#allocation4], 1 }
 0x5b7   :  { %2150 = vsyncpa [#allocation4 + $0x1], 1 }
 0x5b8   :  { %2151 = vsyncpa [#allocation7], 1 }
 0x5b9   :  { %2153 = vsyncpa [#allocation7 + $0x1], 1 }
 0x5ba   :  { %2154 = vsyncpa [#allocation10], 1 }
 0x5bb   :  { %2155 = vsyncpa [#allocation13], 1 }
 0x5bc   :  { %2156 = vsyncpa [#allocation5], 1 }
 0x5bd   :  { %2158 = vsyncpa [#allocation5 + $0x1], 1 }

</bundles_post_ra>
